<compile_context>
chip_gen: v7x
topology: tpu7x:2x2x1
jax: 0.10.0
libtpu: 0.0.40
codegen_flags: <defaults>
</compile_context>

<pallas_src>
import jax
import jax.numpy as jnp
from jax.experimental import pallas as pl
from jax.experimental.pallas import tpu as pltpu

IN_FEATURES = 784          # 1 x 28 x 28 flattened
HIDDEN = 64
TARGET_OUT = 10            # target network: nn.Linear(784, 10)
TOTAL_PARAMS_TARGET = IN_FEATURES * TARGET_OUT + TARGET_OUT  # 7850

LANE = 128
T_PADDED = ((TOTAL_PARAMS_TARGET + LANE - 1) // LANE) * LANE  # 7936 = 62*128

BATCH_BLOCK = 256          # row-block size used only when B is large


def _oneup_kernel(x_ref, w1_ref, b1_ref, w2_ref, b2_ref, o_ref):
    """One (batch-block, column-block) tile of the 2-layer weight generator.

    Refs (current VMEM tiles):
      x_ref  : (TB, 784)        bf16
      w1_ref : (784, 64)        bf16   (constant across grid)
      b1_ref : (1, 64)          f32    (constant across grid)
      w2_ref : (64, TC)         bf16   (column block)
      b2_ref : (1, TC)          f32    (column block)
      o_ref  : (TB, TC)         f32
    """
    # Layer 1 recomputed per column block (tiny: 784x64) -- no shared scratch,
    # safe under "parallel" dimension semantics on multi-TC chips.
    h = jnp.dot(x_ref[...], w1_ref[...], preferred_element_type=jnp.float32)
    h = jnp.maximum(h + b1_ref[...], 0.0)
    # Keep the big matmul a single-pass bf16 MXU op.
    h = h.astype(w2_ref.dtype)
    out = jnp.dot(h, w2_ref[...], preferred_element_type=jnp.float32) + b2_ref[...]
    o_ref[...] = out.astype(o_ref.dtype)


def _num_column_blocks():
    """2-way column split to engage both TensorCores on v7x, else gridless-ish."""
    try:
        kind = jax.devices()[0].device_kind.lower()
        if "v7" in kind:
            return 2
    except Exception:
        pass
    return 1


def oneup_forward(x, w1, b1r, w2p, b2p, *, num_col_blocks=None):
    """OneUp.forward: returns generated target-net params, shape (B, T_PADDED).

    Columns [0, 7850) are the generated nn.Linear(784, 10) parameters; columns
    [7850, 7936) are exact zeros (lane padding) and must be ignored downstream.

    Expects pre-padded / pre-cast generator params from prepare_params():
      w1  : (784, 64)   bf16        b1r : (1, 64)       f32
      w2p : (64, 7936)  bf16        b2p : (1, 7936)     f32
    """
    B = x.shape[0]
    xf = x.reshape(B, -1).astype(jnp.bfloat16)      # x.view(B, -1), bf16 stream
    assert xf.shape[1] == IN_FEATURES
    Tp = w2p.shape[1]

    if num_col_blocks is None:
        num_col_blocks = _num_column_blocks()
    if Tp % (num_col_blocks * LANE) != 0:
        num_col_blocks = 1
    tc = Tp // num_col_blocks

    # Batch blocking only when B is large (keeps VMEM bounded, double-buffers
    # x-in / out-writeback); otherwise one row block of size B.
    if B > BATCH_BLOCK and B % BATCH_BLOCK == 0:
        tb = BATCH_BLOCK
    else:
        tb = B
    nb = B // tb

    flops = 2 * B * (IN_FEATURES * HIDDEN + HIDDEN * Tp)
    bytes_accessed = (xf.size * 2 * num_col_blocks   # x re-streamed per col block
                      + w1.size * 2 + b1r.size * 4
                      + w2p.size * 2 + b2p.size * 4
                      + B * Tp * 4)                  # f32 output writeback

    out = pl.pallas_call(
        _oneup_kernel,
        out_shape=jax.ShapeDtypeStruct((B, Tp), jnp.float32),
        grid_spec=pltpu.PrefetchScalarGridSpec(
            num_scalar_prefetch=0,
            grid=(nb, num_col_blocks),
            in_specs=[
                pl.BlockSpec((tb, IN_FEATURES), lambda i, j: (i, 0)),   # x rows
                pl.BlockSpec((IN_FEATURES, HIDDEN), lambda i, j: (0, 0)),  # W1 resident
                pl.BlockSpec((1, HIDDEN), lambda i, j: (0, 0)),            # b1 resident
                pl.BlockSpec((HIDDEN, tc), lambda i, j: (0, j)),           # W2 col block
                pl.BlockSpec((1, tc), lambda i, j: (0, j)),                # b2 col block
            ],
            out_specs=pl.BlockSpec((tb, tc), lambda i, j: (i, j)),
        ),
        compiler_params=pltpu.CompilerParams(
            dimension_semantics=("parallel", "parallel")),
        cost_estimate=pl.CostEstimate(
            flops=flops, transcendentals=0, bytes_accessed=bytes_accessed),
    )(xf, w1, b1r, w2p, b2p)

    return out


def init_params(key):
    """Deterministic synthetic init for the weight_generator parameters (f32)."""
    k1, k2, k3, k4 = jax.random.split(key, 4)
    # Linear(784, 64)
    w1 = jax.random.uniform(k1, (IN_FEATURES, HIDDEN), jnp.float32,
                            minval=-1.0, maxval=1.0) / jnp.sqrt(IN_FEATURES)
    b1 = jax.random.uniform(k2, (HIDDEN,), jnp.float32,
                            minval=-1.0, maxval=1.0) / jnp.sqrt(IN_FEATURES)
    # Linear(64, total_params_target)
    w2 = jax.random.uniform(k3, (HIDDEN, TOTAL_PARAMS_TARGET), jnp.float32,
                            minval=-1.0, maxval=1.0) / jnp.sqrt(HIDDEN)
    b2 = jax.random.uniform(k4, (TOTAL_PARAMS_TARGET,), jnp.float32,
                            minval=-1.0, maxval=1.0) / jnp.sqrt(HIDDEN)
    return w1, b1, w2, b2


def prepare_params(w1, b1, w2, b2):
    """One-time (init-time) padding / casting so the hot path has no pads/casts.

    Weights -> bf16 (halves dominant HBM stream); biases stay f32 (tiny).
    """
    pad = T_PADDED - w2.shape[1]
    w2p = jnp.pad(w2, ((0, 0), (0, pad))).astype(jnp.bfloat16)
    b2p = jnp.pad(b2.reshape(1, -1), ((0, 0), (0, pad))).astype(jnp.float32)
    w1b = w1.astype(jnp.bfloat16)
    b1r = b1.reshape(1, -1).astype(jnp.float32)
    return w1b, b1r, w2p, b2p


def reference_forward(x, w1, b1, w2, b2):
    """Same-precision reference: bf16 weights/activations, f32 accumulation."""
    B = x.shape[0]
    xf = x.reshape(B, -1).astype(jnp.bfloat16)
    h = jnp.dot(xf, w1.astype(jnp.bfloat16), preferred_element_type=jnp.float32)
    h = jnp.maximum(h + b1, 0.0).astype(jnp.bfloat16)
    return jnp.dot(h, w2.astype(jnp.bfloat16),
                   preferred_element_type=jnp.float32) + b2


if __name__ == "__main__":
    key = jax.random.PRNGKey(0)
    kx, kp = jax.random.split(key)

    # NCHW input, as the PyTorch module would receive (B=2, C=1, 28, 28).
    x = jax.random.normal(kx, (2, 1, 28, 28), jnp.float32)
    w1, b1, w2, b2 = init_params(kp)

    # Pad / cast the generator weights once, outside the hot path.
    w1_k, b1_k, w2_k, b2_k = prepare_params(w1, b1, w2, b2)

    out_padded = oneup_forward(x, w1_k, b1_k, w2_k, b2_k)
    out_padded = jax.block_until_ready(out_padded)
    assert out_padded.shape == (2, T_PADDED), out_padded.shape

    # Correctness check only (not part of the hot path): compare the first
    # 7850 columns against a same-precision (bf16-weight) reference, and check
    # the padded tail is exactly zero.
    ref = reference_forward(x, w1, b1, w2, b2)
    got = out_padded[:, :TOTAL_PARAMS_TARGET]
    assert jnp.allclose(got, ref, atol=1e-2, rtol=1e-2), "mismatch vs reference"
    assert jnp.all(out_padded[:, TOTAL_PARAMS_TARGET:] == 0.0), "pad not zero"

    print("KERNEL_OK")
</pallas_src>

<mosaic_0001>
module attributes {stable_mosaic.version = 11 : i64} {
  func.func @_oneup_kernel(%arg0: i32, %arg1: i32, %arg2: memref<2x784xbf16, #tpu.memory_space<vmem>>, %arg3: memref<784x64xbf16, #tpu.memory_space<vmem>>, %arg4: memref<1x64xf32, #tpu.memory_space<vmem>>, %arg5: memref<64x7936xbf16, #tpu.memory_space<vmem>>, %arg6: memref<1x7936xf32, #tpu.memory_space<vmem>>, %arg7: memref<2x7936xf32, #tpu.memory_space<vmem>>) attributes {dimension_semantics = [#tpu.dimension_semantics<parallel>, #tpu.dimension_semantics<parallel>], iteration_bounds = array<i64: 1, 1>, scalar_prefetch = 0 : i64, scratch_operands = 0 : i64, tpu.core_type = #tpu.core_type<tc>, window_params = [{transform_indices = @transform_0, window_bounds = array<i64: 2, 784>}, {pipeline_mode = #tpu.pipeline_mode<synchronous>, transform_indices = @transform_1, window_bounds = array<i64: 784, 64>}, {pipeline_mode = #tpu.pipeline_mode<synchronous>, transform_indices = @transform_2, window_bounds = array<i64: 1, 64>}, {transform_indices = @transform_3, window_bounds = array<i64: 64, 7936>}, {transform_indices = @transform_4, window_bounds = array<i64: 1, 7936>}, {transform_indices = @transform_5, window_bounds = array<i64: 2, 7936>}]} {
    %c0 = arith.constant 0 : index
    %c0_0 = arith.constant 0 : index
    %0 = vector.load %arg2[%c0, %c0_0] : memref<2x784xbf16, #tpu.memory_space<vmem>>, vector<2x784xbf16>
    %c0_1 = arith.constant 0 : index
    %c0_2 = arith.constant 0 : index
    %1 = vector.load %arg3[%c0_1, %c0_2] : memref<784x64xbf16, #tpu.memory_space<vmem>>, vector<784x64xbf16>
    %cst = arith.constant dense<0.000000e+00> : vector<2x64xf32>
    %2 = tpu.matmul %0, %1, %cst {dimension_numbers = #tpu.dot_dimension_numbers<[1], [0], [0], [1], [0, 0, 1, 1], [], []>} : vector<2x784xbf16>, vector<784x64xbf16>, vector<2x64xf32> -> vector<2x64xf32>
    %c0_3 = arith.constant 0 : index
    %c0_4 = arith.constant 0 : index
    %3 = vector.load %arg4[%c0_3, %c0_4] : memref<1x64xf32, #tpu.memory_space<vmem>>, vector<1x64xf32>
    %4 = vector.broadcast %3 : vector<1x64xf32> to vector<2x64xf32>
    %5 = arith.addf %2, %4 : vector<2x64xf32>
    %cst_5 = arith.constant 0.000000e+00 : f32
    %6 = vector.broadcast %cst_5 : f32 to vector<2x64xf32>
    %7 = arith.maximumf %5, %6 : vector<2x64xf32>
    %8 = arith.truncf %7 : vector<2x64xf32> to vector<2x64xbf16>
    %c0_6 = arith.constant 0 : index
    %c0_7 = arith.constant 0 : index
    %9 = vector.load %arg5[%c0_6, %c0_7] : memref<64x7936xbf16, #tpu.memory_space<vmem>>, vector<64x7936xbf16>
    %cst_8 = arith.constant dense<0.000000e+00> : vector<2x7936xf32>
    %10 = tpu.matmul %8, %9, %cst_8 {dimension_numbers = #tpu.dot_dimension_numbers<[1], [0], [0], [1], [0, 0, 1, 1], [], []>} : vector<2x64xbf16>, vector<64x7936xbf16>, vector<2x7936xf32> -> vector<2x7936xf32>
    %c0_9 = arith.constant 0 : index
    %c0_10 = arith.constant 0 : index
    %11 = vector.load %arg6[%c0_9, %c0_10] : memref<1x7936xf32, #tpu.memory_space<vmem>>, vector<1x7936xf32>
    %12 = vector.broadcast %11 : vector<1x7936xf32> to vector<2x7936xf32>
    %13 = arith.addf %10, %12 : vector<2x7936xf32>
    %c0_11 = arith.constant 0 : index
    %c0_12 = arith.constant 0 : index
    %14 = vector.load %arg7[%c0_11, %c0_12] : memref<2x7936xf32, #tpu.memory_space<vmem>>, vector<2x7936xf32>
    tpu.vector_store %arg7[%c0_11, %c0_12], %13 {strides = array<i32>} : memref<2x7936xf32, #tpu.memory_space<vmem>>, vector<2x7936xf32>,
    return
  }
  func.func @transform_0(%arg0: i32, %arg1: i32) -> (i32, i32) {
    %c0_i32 = arith.constant 0 : i32
    %c0_i32_0 = arith.constant 0 : i32
    return %arg0, %c0_i32 : i32, i32
  }
  func.func @transform_1(%arg0: i32, %arg1: i32) -> (i32, i32) {
    %c0_i32 = arith.constant 0 : i32
    %c0_i32_0 = arith.constant 0 : i32
    %c0_i32_1 = arith.constant 0 : i32
    return %c0_i32, %c0_i32_0 : i32, i32
  }
  func.func @transform_2(%arg0: i32, %arg1: i32) -> (i32, i32) {
    %c0_i32 = arith.constant 0 : i32
    %c0_i32_0 = arith.constant 0 : i32
    %c0_i32_1 = arith.constant 0 : i32
    return %c0_i32, %c0_i32_0 : i32, i32
  }
  func.func @transform_3(%arg0: i32, %arg1: i32) -> (i32, i32) {
    %c0_i32 = arith.constant 0 : i32
    %c0_i32_0 = arith.constant 0 : i32
    return %c0_i32, %arg1 : i32, i32
  }
  func.func @transform_4(%arg0: i32, %arg1: i32) -> (i32, i32) {
    %c0_i32 = arith.constant 0 : i32
    %c0_i32_0 = arith.constant 0 : i32
    return %c0_i32, %arg1 : i32, i32
  }
  func.func @transform_5(%arg0: i32, %arg1: i32) -> (i32, i32) {
    %c0_i32 = arith.constant 0 : i32
    return %arg0, %arg1 : i32, i32
  }
}

</mosaic_0001>

<bundles_post_ra>
// kernel: tpu_custom_call.1
= control target key start
LH: loop header
LB: loop body
LE: loop exit
PB: predicated region body
PF: predicated region fallthrough
CT: control target
= control target key end

     0   :  { %10 = vsyncpa [#allocation3], 0  ;;  %s5550_s0 = inlined_call_operand.vmem [shape: bf16[2,784], index: 0, kind: input, shape index: {}]   ;;  %s5551_s1 = inlined_call_operand.vmem [shape: bf16[784,64], index: 1, kind: input, shape index: {}]   ;;  %s5552_s2 = inlined_call_operand.vmem [shape: f32[1,64], index: 2, kind: input, shape index: {}]   ;;  %s5553_s3 = inlined_call_operand.hbm [shape: bf16[64,7936], index: 3, kind: input, shape index: {}]   ;;  %s5554_s4 = inlined_call_operand.vmem [shape: f32[1,7936], index: 4, kind: input, shape index: {}]   ;;  %s5555_s5 = inlined_call_operand.hbm [shape: f32[2,7936], index: 5, kind: output, shape index: {}]  }
   0x1   :  { %11 = vsyncpa [#allocation4], 0  ;;  %s5002_s18 = smov [#allocation2]   ;;  %s4954_s22 = scalar_lea.hbm %s5553_s3, 31744 }
   0x2   :  { %s23_s19 = sshll.u32 %s5002_s18, 4  ;;  %p4955_p0 = scmp.ne.s32.totalorder %s5553_s3, %s4954_s22  ;;  %s24_s19 = int_to_ptr.vmem [resolvable:$true] %s23_s19 }
   0x3   :  { %p4958_p1 = scmp.lt.u32.totalorder %s4954_s22, %s5553_s3 }
   0x5   :  { %p4960_p2 = pnand %p4958_p1, %p4955_p0 }
   0x7   :  { %4963 = shalt.err (!%p4960_p2)
}
   0x8   :  { %s4964_s27 = scalar_lea.vmem %s24_s19, 31744  ;;  %p4969_p4 = scmp.lt.s32.totalorder %s24_s19, %s24_s19 }
   0x9   :  { %p4965_p3 = scmp.ne.s32.totalorder %s24_s19, %s4964_s27  ;;  %p4970_p5 = scmp.lt.s32.totalorder %s4964_s27, %s4964_s27 }
   0xb   :  { %p4971_p6 = por %p4970_p5, %p4969_p4 }
   0xd   :  { %p4972_p7 = pnand %p4971_p6, %p4965_p3 }
   0xf   :  { %4975 = shalt.err (!%p4972_p7)
}
  0x10   :  { %s5003_s28 = smov 3968   ;;  %s5004_s29 = smov 248  }
  0x11   :  { %29 = dma.hbm_to_vmem [thread:$0]  %s5553_s3, 31744, %s24_s19, [#allocation3], %s5003_s28, %s5003_s28, %s5004_s29  }
  0x12   :  { %4998 = dma.done.wait [#allocation3], 31744  }
  0x13   :  { %4999 = vsyncadd [#allocation3], 4294935552  ;;  %v4532_v0 = vld [vmem:[%s5551_s1 + $0x40] sm:$0xff]   ;;  %v4536_v4 = vld [vmem:[%s5551_s1 + $0x48] sm:$0xff]   ;;  %v5005_v21 = vmov 1966171168   ;;  %v147_v23 = vlaneseq }
  0x14   :  { %v4533_v1 = vld [vmem:[%s5551_s1] sm:$0xff]   ;;  %4449 = vmatprep.subr.bf16.mxu0 %v4532_v0  ;;  %v4537_v5 = vld [vmem:[%s5551_s1 + $0x8] sm:$0xff]   ;;  %v4540_v8 = vld [vmem:[%s5551_s1 + $0x50] sm:$0xff]   ;;  %v145_v22 = vunpack.c.l.s4 %v5005_v21  ;;  %v5006_v45 = vmov 0.0   ;;  %vm5007_vm0 = vmmov 0   ;;  %vm491_vm1 = vcmask 130048  }
  0x15   :  { %v4534_v2 = vld [vmem:[%s5551_s1 + $0xc0] sm:$0xff]   ;;  %4450 = vmatpush3.bf16.msra.mxu0 %v4533_v1  ;;  %v4538_v6 = vld [vmem:[%s5551_s1 + $0xc8] sm:$0xff]   ;;  %v4541_v9 = vld [vmem:[%s5551_s1 + $0x10] sm:$0xff]   ;;  %v5128_v29 = vshrl.u32 %v147_v23, 7  ;;  %v5008_v23 = vmov 0   ;;  %vm2471_vm2 = vcmask 523264  }
  0x16   :  { %v4535_v3 = vld [vmem:[%s5551_s1 + $0x80] sm:$0xff]   ;;  %4471 = vmatprep.subr.bf16.mxu1 %v4534_v2  ;;  %4451 = vmatprep.subr.bf16.mxu0 %v4536_v4  ;;  %v4539_v7 = vld [vmem:[%s5551_s1 + $0x88] sm:$0xff]   ;;  %v4542_v10 = vld [vmem:[%s5551_s1 + $0xd0] sm:$0xff]   ;;  %v146_v28 = vunpack.c.0.s8 %v145_v22 }
  0x17   :  { %4472 = vmatpush3.bf16.msra.mxu1 %v4535_v3  ;;  %v4543_v11 = vld [vmem:[%s5551_s1 + $0x90] sm:$0xff]   ;;  %v4544_v12 = vld [vmem:[%s5551_s1 + $0x58] sm:$0xff]   ;;  %v4548_v16 = vld [vmem:[%s5551_s1 + $0x60] sm:$0xff]  }
  0x18   :  { %4473 = vmatprep.subr.bf16.mxu1 %v4538_v6  ;;  %v4545_v13 = vld [vmem:[%s5551_s1 + $0x18] sm:$0xff]   ;;  %v4549_v17 = vld [vmem:[%s5551_s1 + $0x20] sm:$0xff]   ;;  %v4552_v20 = vld [vmem:[%s5551_s1 + $0x68] sm:$0xff]   ;;  %v149_v34 = vsub.s32 %v146_v28, %v5128_v29 }
  0x19   :  { %4452 = vmatpush3.bf16.msra.mxu0 %v4537_v5  ;;  %v4546_v14 = vld [vmem:[%s5551_s1 + $0xd8] sm:$0xff]   ;;  %v4550_v18 = vld [vmem:[%s5551_s1 + $0xe0] sm:$0xff]   ;;  %v4553_v24 = vld [vmem:[%s5551_s1 + $0x28] sm:$0xff]  }
  0x1a   :  { %4453 = vmatprep.subr.bf16.mxu0 %v4540_v8  ;;  %v4547_v15 = vld [vmem:[%s5551_s1 + $0x98] sm:$0xff]   ;;  %v4551_v19 = vld [vmem:[%s5551_s1 + $0xa0] sm:$0xff]   ;;  %v4554_v25 = vld [vmem:[%s5551_s1 + $0xe8] sm:$0xff]  }
  0x1b   :  { %4474 = vmatpush3.bf16.msra.mxu1 %v4539_v7  ;;  %v4555_v26 = vld [vmem:[%s5551_s1 + $0xa8] sm:$0xff]   ;;  %v4556_v27 = vld [vmem:[%s5551_s1 + $0x70] sm:$0xff]   ;;  %v4560_v33 = vld [vmem:[%s5551_s1 + $0x78] sm:$0xff]  }
  0x1c   :  { %4475 = vmatprep.subr.bf16.mxu1 %v4542_v10  ;;  %v4557_v30 = vld [vmem:[%s5551_s1 + $0x30] sm:$0xff]   ;;  %v4561_v35 = vld [vmem:[%s5551_s1 + $0x38] sm:$0xff]   ;;  %v36_v37 = vld [vmem:[%s5550_s0] sm:$0x7f] }
  0x1d   :  { %4454 = vmatpush3.bf16.msra.mxu0 %v4541_v9  ;;  %v4558_v31 = vld [vmem:[%s5551_s1 + $0xf0] sm:$0xff]   ;;  %v4562_v36 = vld [vmem:[%s5551_s1 + $0xf8] sm:$0xff]   ;;  %v143_v38 = vcombine.high %v36_v37, %v36_v37  ;;  %v150_v39 = vrot.slane %v36_v37, %v149_v34  ;;  %v4565_v41 = vld [vmem:[%s5551_s1 + $0x140] sm:$0xff]  }
  0x1e   :  { %4455 = vmatprep.subr.bf16.mxu0 %v4544_v12  ;;  %v4559_v32 = vld [vmem:[%s5551_s1 + $0xb0] sm:$0xff]   ;;  %v4564_v40 = vld [vmem:[%s5551_s1 + $0xb8] sm:$0xff]   ;;  %v4566_v47 = vld [vmem:[%s5551_s1 + $0x100] sm:$0xff]  }
  0x1f   :  { %4476 = vmatpush3.bf16.msra.mxu1 %v4543_v11  ;;  %v158_v42 = vcombine.high %v150_v39, %v150_v39  ;;  %v166_v43 = vrot.slane %v150_v39, %v149_v34  ;;  %v157_v44 = vrot.slane %v143_v38, %v149_v34  ;;  %v4567_v50 = vld [vmem:[%s5551_s1 + $0x148] sm:$0xff]   ;;  %v4569_v54 = vld [vmem:[%s5551_s1 + $0x150] sm:$0xff]   ;;  %v4571_v56 = vld [vmem:[%s5551_s1 + $0x158] sm:$0xff]  }
  0x20   :  { %4477 = vmatprep.subr.bf16.mxu1 %v4546_v14  ;;  %v4568_v53 = vld [vmem:[%s5551_s1 + $0x108] sm:$0xff]   ;;  %v4570_v55 = vld [vmem:[%s5551_s1 + $0x110] sm:$0xff]   ;;  %v4572_v58 = vld [vmem:[%s5551_s1 + $0x118] sm:$0xff]  }
  0x21   :  { %4456 = vmatpush3.bf16.msra.mxu0 %v4545_v13  ;;  %v180_v46 = vrot.slane %v158_v42, %v149_v34  ;;  %v159_v48 = vcombine.high %v157_v44, %v157_v44  ;;  %v188_v49 = vcombine.high %v166_v43, %v166_v43  ;;  %v173_v57 = vrot.slane %v157_v44, %v149_v34  ;;  %v4573_v59 = vld [vmem:[%s5551_s1 + $0x160] sm:$0xff]   ;;  %v4575_v63 = vld [vmem:[%s5551_s1 + $0x168] sm:$0xff]   ;;  %v4577_v1 = vld [vmem:[%s5551_s1 + $0x170] sm:$0xff]  }
  0x22   :  { %4457 = vmatprep.subr.bf16.mxu0 %v4548_v16  ;;  %v4581_v60 = vld [vmem:[%s5551_s1 + $0x180] sm:$0xff]   ;;  %v4576_v0 = vld [vmem:[%s5551_s1 + $0x128] sm:$0xff]   ;;  %v4578_v2 = vld [vmem:[%s5551_s1 + $0x130] sm:$0xff]  }
  0x23   :  { %4478 = vmatpush3.bf16.msra.mxu1 %v4547_v15  ;;  %527 = vmatprep.mubr.bf16.mxu0 %v180_v46  ;;  %v190_v51 = vcombine.high %v180_v46, %v180_v46  ;;  %v187_v52 = vrot.slane %v159_v48, %v149_v34  ;;  %v4574_v61 = vld [vmem:[%s5551_s1 + $0x120] sm:$0xff]   ;;  %v189_v62 = vcombine.high %v173_v57, %v173_v57  ;;  %v4579_v3 = vld [vmem:[%s5551_s1 + $0x178] sm:$0xff]   ;;  %v4585_v7 = vld [vmem:[#allocation2 + $0x10] ss:$248 sps:$4 sm:$0xff]  }
  0x24   :  { %4479 = vmatprep.subr.bf16.mxu1 %v4550_v18  ;;  %v4580_v4 = vld [vmem:[%s5551_s1 + $0x138] sm:$0xff]   ;;  %v4587_v8 = vld [vmem:[#allocation2 + $0x14] ss:$248 sps:$4 sm:$0xff]   ;;  %v4588_v9 = vld [vmem:[#allocation2 + $0x1f0] ss:$248 sps:$4 sm:$0xff]  }
  0x25   :  { %4458 = vmatpush3.bf16.msra.mxu0 %v4549_v17  ;;  %567 = vmatprep.mubr.bf16.mxu1 %v190_v51  ;;  %v4582_v5 = vld [vmem:[#allocation2] ss:$248 sps:$4 sm:$0xff]   ;;  %v4584_v6 = vld [vmem:[#allocation2 + $0x4] ss:$248 sps:$4 sm:$0xff]   ;;  %v4590_v10 = vld [vmem:[#allocation2 + $0x1f4] ss:$248 sps:$4 sm:$0xff]  }
  0x26   :  { %4459 = vmatprep.subr.bf16.mxu0 %v4552_v20  ;;  %v4591_v11 = vld [vmem:[#allocation2 + $0x200] ss:$248 sps:$4 sm:$0xff]   ;;  %v4593_v12 = vld [vmem:[#allocation2 + $0x204] ss:$248 sps:$4 sm:$0xff]   ;;  %v4599_v14 = vld [vmem:[#allocation2 + $0x3f4] ss:$248 sps:$4 sm:$0xff]  }
  0x27   :  { %4480 = vmatpush3.bf16.msra.mxu1 %v4551_v19  ;;  %v4596_v13 = vld [vmem:[#allocation2 + $0x3e4] ss:$248 sps:$4 sm:$0xff]   ;;  %v4594_v15 = vld [vmem:[#allocation2 + $0x3e0] ss:$248 sps:$4 sm:$0xff]   ;;  %v4597_v16 = vld [vmem:[#allocation2 + $0x3f0] ss:$248 sps:$4 sm:$0xff]  }
  0x28   :  { %4481 = vmatprep.subr.bf16.mxu1 %v4554_v25  ;;  %v4602_v17 = vld [vmem:[#allocation2 + $0x5d4] ss:$248 sps:$4 sm:$0xff]   ;;  %v4605_v18 = vld [vmem:[#allocation2 + $0x5e4] ss:$248 sps:$4 sm:$0xff]   ;;  %v4600_v19 = vld [vmem:[#allocation2 + $0x5d0] ss:$248 sps:$4 sm:$0xff]  }
  0x29   :  { %4460 = vmatpush3.bf16.msra.mxu0 %v4553_v24  ;;  %v4603_v20 = vld [vmem:[#allocation2 + $0x5e0] ss:$248 sps:$4 sm:$0xff]   ;;  %v4608_v21 = vld [vmem:[#allocation2 + $0xc] ss:$248 sps:$4 sm:$0xff]  }
  0x2a   :  { %4461 = vmatprep.subr.bf16.mxu0 %v4556_v27  ;;  %v4611_v22 = vld [vmem:[#allocation2 + $0x24] ss:$248 sps:$4 sm:$0xff]   ;;  %v4118_v25 = vld [vmem:[%s5552_s2] ss:$0 sm:$0xff] }
  0x2b   :  { %4482 = vmatpush3.bf16.msra.mxu1 %v4555_v26  ;;  %v4609_v51 = vld [vmem:[#allocation2 + $0x20] ss:$248 sps:$4 sm:$0xff]  }
  0x2c   :  { %4483 = vmatprep.subr.bf16.mxu1 %v4558_v31 }
  0x2d   :  { %4462 = vmatpush3.bf16.msra.mxu0 %v4557_v30 }
  0x2e   :  { %4463 = vmatprep.subr.bf16.mxu0 %v4560_v33 }
  0x2f   :  { %4484 = vmatpush3.bf16.msra.mxu1 %v4559_v32 }
  0x30   :  { %4485 = vmatprep.subr.bf16.mxu1 %v4562_v36 }
  0x31   :  { %4464 = vmatpush3.bf16.msra.mxu0 %v4561_v35 }
  0x32   :  { %4493 = vmatprep.subr.bf16.mxu0 %v4565_v41 }
  0x33   :  { %4486 = vmatpush3.bf16.msra.mxu1 %v4564_v40 }
  0x34   :  { %4517 = vmatprep.subr.bf16.mxu1 %v5006_v45  ;;  %528 = vmatmul.mubr.bf16.vlgmr.msra.gmra.mrb[0].mxu0 %v166_v43 }
  0x35   :  { %4494 = vmatpush3.bf16.msra.mxu0 %v4566_v47  ;;  %607 = vmatprep.mubr.bf16.mxu0 %v187_v52 }
  0x36   :  { %568 = vmatmul.mubr.bf16.vlgmr.msra.gmra.mrb[0].mxu1 %v188_v49  ;;  %4495 = vmatprep.subr.bf16.mxu0 %v4567_v50  ;;  %v4606_v50 = vld [vmem:[#allocation2 + $0x8] ss:$248 sps:$4 sm:$0xff]  }
  0x37   :  { %4519 = vmatprep.mubr.msk.bf16.mxu1 %vm5007_vm0, %v5006_v45  ;;  %4518 = vmatpush3.bf16.msra.mxu1 %v4581_v60  ;;  %v4621_v60 = vld [vmem:[#allocation2 + $0x400] ss:$248 sps:$4 sm:$0xff]  }
  0x38   :  { %2475 = vmatprep.subr.bf16.mxu1 %v4584_v6  ;;  %v4641_v6 = vld [vmem:[#allocation2 + $0x224] ss:$248 sps:$4 sm:$0xff]  }
  0x39   :  { %4496 = vmatpush3.bf16.msra.mxu0 %v4568_v53  ;;  %v4614_v53 = vld [vmem:[#allocation2 + $0x1fc] ss:$248 sps:$4 sm:$0xff]  }
  0x3a   :  { %4497 = vmatprep.subr.bf16.mxu0 %v4569_v54  ;;  %v4617_v54 = vld [vmem:[#allocation2 + $0x214] ss:$248 sps:$4 sm:$0xff]  }
  0x3d   :  { %4498 = vmatpush3.bf16.msra.mxu0 %v4570_v55  ;;  %v4612_v55 = vld [vmem:[#allocation2 + $0x1f8] ss:$248 sps:$4 sm:$0xff]  }
  0x3e   :  { %4499 = vmatprep.subr.bf16.mxu0 %v4571_v56  ;;  %4520 = vmatmul.mubr.msk.bf16.vlgmr.msra.gmra.mrb[4].mxu1 %vm491_vm1, %v189_v62  ;;  %v4615_v56 = vld [vmem:[#allocation2 + $0x210] ss:$248 sps:$4 sm:$0xff]   ;;  %v4629_v62 = vld [vmem:[#allocation2 + $0x5f4] ss:$248 sps:$4 sm:$0xff]  }
  0x3f   :  { %2476 = vmatpush1.bf16.msra.mxu1 %v4582_v5  ;;  %2507 = vmatprep.mubr.bf16.mxu1 %v5008_v23  ;;  %v4638_v5 = vld [vmem:[#allocation2 + $0x20c] ss:$248 sps:$4 sm:$0xff]  }
  0x40   :  { %2477 = vmatprep.subr.bf16.mxu1 %v4590_v10  ;;  %v4647_v10 = vld [vmem:[#allocation2 + $0x414] ss:$248 sps:$4 sm:$0xff]  }
  0x41   :  { %4500 = vmatpush3.bf16.msra.mxu0 %v4572_v58  ;;  %v4623_v58 = vld [vmem:[#allocation2 + $0x404] ss:$248 sps:$4 sm:$0xff]  }
  0x42   :  { %4501 = vmatprep.subr.bf16.mxu0 %v4573_v59  ;;  %v4618_v59 = vld [vmem:[#allocation2 + $0x3e8] ss:$248 sps:$4 sm:$0xff]  }
  0x43   :  { %2478 = vmatpush1.bf16.msra.mxu1 %v4588_v9  ;;  %v4644_v9 = vld [vmem:[#allocation2 + $0x3fc] ss:$248 sps:$4 sm:$0xff]  }
  0x44   :  { %2479 = vmatprep.subr.bf16.mxu1 %v4596_v13  ;;  %v4650_v13 = vld [vmem:[#allocation2 + $0x5ec] ss:$248 sps:$4 sm:$0xff]  }
  0x45   :  { %4502 = vmatpush3.bf16.msra.mxu0 %v4574_v61  ;;  %v4626_v61 = vld [vmem:[#allocation2 + $0x5dc] ss:$248 sps:$4 sm:$0xff]  }
  0x46   :  { %4503 = vmatprep.subr.bf16.mxu0 %v4575_v63  ;;  %v4624_v63 = vld [vmem:[#allocation2 + $0x5d8] ss:$248 sps:$4 sm:$0xff]  }
  0x47   :  { %2480 = vmatpush1.bf16.msra.mxu1 %v4594_v15  ;;  %v4648_v15 = vld [vmem:[#allocation2 + $0x5e8] ss:$248 sps:$4 sm:$0xff]  }
  0x48   :  { %2481 = vmatprep.subr.bf16.mxu1 %v4602_v17  ;;  %v4656_v17 = vld [vmem:[#allocation2 + $0x2c] ss:$248 sps:$4 sm:$0xff]  }
  0x49   :  { %4504 = vmatpush3.bf16.msra.mxu0 %v4576_v0  ;;  %v4627_v0 = vld [vmem:[#allocation2 + $0x5f0] ss:$248 sps:$4 sm:$0xff]  }
  0x4a   :  { %4505 = vmatprep.subr.bf16.mxu0 %v4577_v1  ;;  %v4632_v1 = vld [vmem:[#allocation2 + $0x1c] ss:$248 sps:$4 sm:$0xff]  }
  0x4b   :  { %2482 = vmatpush1.bf16.msra.mxu1 %v4600_v19  ;;  %v4654_v19 = vld [vmem:[#allocation2 + $0x28] ss:$248 sps:$4 sm:$0xff]  }
  0x4c   :  { %2516 = vmatprep.subr.bf16.mxu1 %v4608_v21  ;;  %v4662_v21 = vld [vmem:[#allocation2 + $0x21c] ss:$248 sps:$4 sm:$0xff]  }
  0x4d   :  { %4506 = vmatpush3.bf16.msra.mxu0 %v4578_v2  ;;  %v4635_v2 = vld [vmem:[#allocation2 + $0x34] ss:$248 sps:$4 sm:$0xff]  }
  0x4e   :  { %4507 = vmatprep.subr.bf16.mxu0 %v4579_v3  ;;  %v4630_v3 = vld [vmem:[#allocation2 + $0x18] ss:$248 sps:$4 sm:$0xff]  }
  0x51   :  { %4508 = vmatpush3.bf16.msra.mxu0 %v4580_v4  ;;  %v4633_v4 = vld [vmem:[#allocation2 + $0x30] ss:$248 sps:$4 sm:$0xff]  }
  0x52   :  { %2557 = vmatprep.subr.bf16.mxu0 %v4587_v8  ;;  %v4639_v8 = vld [vmem:[#allocation2 + $0x220] ss:$248 sps:$4 sm:$0xff]  }
  0x54   :  { %608 = vmatmul.mubr.bf16.vlgmr.msra.gmra.mrb[4].mxu0 %v173_v57  ;;  %v4620_v57 = vld [vmem:[#allocation2 + $0x3ec] ss:$248 sps:$4 sm:$0xff]  }
  0x55   :  { %2558 = vmatpush1.bf16.msra.mxu0 %v4585_v7  ;;  %2589 = vmatprep.mubr.bf16.mxu0 %v5008_v23  ;;  %v4636_v7 = vld [vmem:[#allocation2 + $0x208] ss:$248 sps:$4 sm:$0xff]  }
  0x56   :  { %2559 = vmatprep.subr.bf16.mxu0 %v4593_v12  ;;  %v4645_v12 = vld [vmem:[#allocation2 + $0x410] ss:$248 sps:$4 sm:$0xff]  }
  0x59   :  { %2560 = vmatpush1.bf16.msra.mxu0 %v4591_v11  ;;  %v4642_v11 = vld [vmem:[#allocation2 + $0x3f8] ss:$248 sps:$4 sm:$0xff]  }
  0x5a   :  { %2561 = vmatprep.subr.bf16.mxu0 %v4599_v14  ;;  %v4653_v14 = vld [vmem:[#allocation2 + $0x604] ss:$248 sps:$4 sm:$0xff]  }
  0x5d   :  { %2562 = vmatpush1.bf16.msra.mxu0 %v4597_v16  ;;  %v4651_v16 = vld [vmem:[#allocation2 + $0x600] ss:$248 sps:$4 sm:$0xff]  }
  0x5e   :  { %2563 = vmatprep.subr.bf16.mxu0 %v4605_v18  ;;  %v4659_v18 = vld [vmem:[#allocation2 + $0x44] ss:$248 sps:$4 sm:$0xff]  }
  0x61   :  { %2564 = vmatpush1.bf16.msra.mxu0 %v4603_v20  ;;  %v4657_v20 = vld [vmem:[#allocation2 + $0x40] ss:$248 sps:$4 sm:$0xff]  }
  0x62   :  { %2639 = vmatprep.subr.bf16.mxu0 %v4611_v22  ;;  %v4665_v22 = vld [vmem:[#allocation2 + $0x234] ss:$248 sps:$4 sm:$0xff]  }
 0x107   :  { %v4465_v24 = vpop.f32.mrb[0].mxu0 }
 0x108   :  { %v4466_v26 = vpop.f32.mrb[1].mxu0 }
 0x109   :  { %v4467_v27 = vadd.f32 %v4466_v26, %v4465_v24  ;;  %v4468_v28 = vpop.f32.mrb[2].mxu0  ;;  %v4487_v30 = vpop.f32.mrb[0].mxu1  ;;  %v4660_v24 = vld [vmem:[#allocation2 + $0x218] ss:$248 sps:$4 sm:$0xff]   ;;  %v4668_v26 = vld [vmem:[#allocation2 + $0x40c] ss:$248 sps:$4 sm:$0xff]  }
 0x10a   :  { %v4469_v31 = vpop.f32.mrb[3].mxu0  ;;  %v4488_v32 = vpop.f32.mrb[1].mxu1  ;;  %v4666_v28 = vld [vmem:[#allocation2 + $0x408] ss:$248 sps:$4 sm:$0xff]  }
 0x10b   :  { %v530_v33 = vadd.f32 %v4467_v27, %v4118_v25  ;;  %v4489_v34 = vadd.f32 %v4488_v32, %v4487_v30  ;;  %v4490_v35 = vpop.f32.mrb[2].mxu1  ;;  %v4663_v25 = vld [vmem:[#allocation2 + $0x230] ss:$248 sps:$4 sm:$0xff]   ;;  %v4671_v27 = vld [vmem:[#allocation2 + $0x424] ss:$248 sps:$4 sm:$0xff]  }
 0x10c   :  { %v4491_v36 = vpop.f32.mrb[3].mxu1  ;;  %v4669_v30 = vld [vmem:[#allocation2 + $0x420] ss:$248 sps:$4 sm:$0xff]   ;;  %v4674_v31 = vld [vmem:[#allocation2 + $0x5fc] ss:$248 sps:$4 sm:$0xff]  }
 0x10d   :  { %v570_v37 = vadd.f32 %v4489_v34, %v530_v33  ;;  %v4677_v32 = vld [vmem:[#allocation2 + $0x614] ss:$248 sps:$4 sm:$0xff]   ;;  %v4672_v33 = vld [vmem:[#allocation2 + $0x5f8] ss:$248 sps:$4 sm:$0xff]  }
 0x10e   :  { %v4675_v34 = vld [vmem:[#allocation2 + $0x610] ss:$248 sps:$4 sm:$0xff]   ;;  %v4680_v35 = vld [vmem:[#allocation2 + $0x3c] ss:$248 sps:$4 sm:$0xff]  }
 0x10f   :  { %v4683_v36 = vld [vmem:[#allocation2 + $0x54] ss:$248 sps:$4 sm:$0xff]  }
 0x111   :  { %v649_v38 = vpop.f32.mrb[4].mxu1 }
 0x112   :  { %v4521_v39 = vpop.f32.mrb[5].mxu1 }
 0x113   :  { %v652_v40 = vpop.f32.mrb[6].mxu1  ;;  %v4686_v39 = vld [vmem:[#allocation2 + $0x22c] ss:$248 sps:$4 sm:$0xff]  }
 0x114   :  { %v4522_v41 = vpop.f32.mrb[7].mxu1  ;;  %v4689_v40 = vld [vmem:[#allocation2 + $0x244] ss:$248 sps:$4 sm:$0xff]  }
 0x115   :  { %v4684_v41 = vld [vmem:[#allocation2 + $0x228] ss:$248 sps:$4 sm:$0xff]  }
 0x127   :  { %v4509_v42 = vpop.f32.mrb[4].mxu0 }
 0x128   :  { %v4510_v43 = vpop.f32.mrb[5].mxu0 }
 0x129   :  { %v4511_v44 = vadd.f32 %v4510_v43, %v4509_v42  ;;  %v4512_v45 = vpop.f32.mrb[6].mxu0  ;;  %v4687_v42 = vld [vmem:[#allocation2 + $0x240] ss:$248 sps:$4 sm:$0xff]   ;;  %v4692_v43 = vld [vmem:[#allocation2 + $0x41c] ss:$248 sps:$4 sm:$0xff]  }
 0x12a   :  { %v4513_v46 = vpop.f32.mrb[7].mxu0  ;;  %v4690_v45 = vld [vmem:[#allocation2 + $0x418] ss:$248 sps:$4 sm:$0xff]  }
 0x12b   :  { %v610_v47 = vadd.f32 %v4511_v44, %v570_v37  ;;  %v4678_v37 = vld [vmem:[#allocation2 + $0x38] ss:$248 sps:$4 sm:$0xff]   ;;  %v4695_v44 = vld [vmem:[#allocation2 + $0x434] ss:$248 sps:$4 sm:$0xff]  }
 0x12c   :  { %v4693_v46 = vld [vmem:[#allocation2 + $0x430] ss:$248 sps:$4 sm:$0xff]  }
 0x12d   :  { %v650_v48 = vadd.f32 %v649_v38, %v610_v47  ;;  %v4681_v38 = vld [vmem:[#allocation2 + $0x50] ss:$248 sps:$4 sm:$0xff]   ;;  %v4698_v47 = vld [vmem:[#allocation2 + $0x60c] ss:$248 sps:$4 sm:$0xff]  }
 0x12f   :  { %v655_v49 = vmax.f32 %v650_v48, 0.0  ;;  %v4701_v48 = vld [vmem:[#allocation2 + $0x624] ss:$248 sps:$4 sm:$0xff]  }
 0x131   :  { %v5211_v52 = vpack.c.bf16 %v655_v49, %v655_v49  ;;  %v4696_v49 = vld [vmem:[#allocation2 + $0x608] ss:$248 sps:$4 sm:$0xff]  }
 0x133   :  { %4417 = vmatmul.mubr.msk.bf16.vlgmr.msra.gmra.mrb[8].mxu1 %vm2471_vm2, %v5211_v52  ;;  %4419 = vmatmul.mubr.msk.bf16.vlgmr.msra.gmra.mrb[8].mxu0 %vm2471_vm2, %v5211_v52 }
 0x134   :  { %2517 = vmatpush1.bf16.msra.mxu1 %v4606_v50  ;;  %2640 = vmatpush1.bf16.msra.mxu0 %v4609_v51  ;;  %v4699_v50 = vld [vmem:[#allocation2 + $0x620] ss:$248 sps:$4 sm:$0xff]   ;;  %v4704_v51 = vld [vmem:[#allocation2 + $0x4c] ss:$248 sps:$4 sm:$0xff]  }
 0x135   :  { %2518 = vmatprep.subr.bf16.mxu1 %v4614_v53  ;;  %2641 = vmatprep.subr.bf16.mxu0 %v4617_v54  ;;  %v4707_v53 = vld [vmem:[#allocation2 + $0x64] ss:$248 sps:$4 sm:$0xff]   ;;  %v4702_v54 = vld [vmem:[#allocation2 + $0x48] ss:$248 sps:$4 sm:$0xff]  }
 0x136   :  { %2548 = vmatprep.mubr.bf16.mxu1 %v5008_v23  ;;  %2671 = vmatprep.mubr.bf16.mxu0 %v5008_v23 }
 0x138   :  { %2519 = vmatpush1.bf16.msra.mxu1 %v4612_v55  ;;  %2642 = vmatpush1.bf16.msra.mxu0 %v4615_v56  ;;  %v4705_v55 = vld [vmem:[#allocation2 + $0x60] ss:$248 sps:$4 sm:$0xff]   ;;  %v4710_v56 = vld [vmem:[#allocation2 + $0x23c] ss:$248 sps:$4 sm:$0xff]  }
 0x139   :  { %2520 = vmatprep.subr.bf16.mxu1 %v4620_v57  ;;  %2643 = vmatprep.subr.bf16.mxu0 %v4623_v58  ;;  %v4713_v57 = vld [vmem:[#allocation2 + $0x254] ss:$248 sps:$4 sm:$0xff]   ;;  %v4708_v58 = vld [vmem:[#allocation2 + $0x238] ss:$248 sps:$4 sm:$0xff]  }
 0x13c   :  { %2521 = vmatpush1.bf16.msra.mxu1 %v4618_v59  ;;  %2644 = vmatpush1.bf16.msra.mxu0 %v4621_v60  ;;  %v4711_v59 = vld [vmem:[#allocation2 + $0x250] ss:$248 sps:$4 sm:$0xff]   ;;  %v4716_v60 = vld [vmem:[#allocation2 + $0x42c] ss:$248 sps:$4 sm:$0xff]  }
 0x13d   :  { %2522 = vmatprep.subr.bf16.mxu1 %v4626_v61  ;;  %2645 = vmatprep.subr.bf16.mxu0 %v4629_v62  ;;  %v4719_v61 = vld [vmem:[#allocation2 + $0x444] ss:$248 sps:$4 sm:$0xff]   ;;  %v4714_v62 = vld [vmem:[#allocation2 + $0x428] ss:$248 sps:$4 sm:$0xff]  }
 0x140   :  { %2523 = vmatpush1.bf16.msra.mxu1 %v4624_v63  ;;  %2646 = vmatpush1.bf16.msra.mxu0 %v4627_v0  ;;  %v4717_v63 = vld [vmem:[#allocation2 + $0x440] ss:$248 sps:$4 sm:$0xff]   ;;  %v4722_v0 = vld [vmem:[#allocation2 + $0x61c] ss:$248 sps:$4 sm:$0xff]  }
 0x141   :  { %2598 = vmatprep.subr.bf16.mxu1 %v4632_v1  ;;  %2721 = vmatprep.subr.bf16.mxu0 %v4635_v2  ;;  %v4725_v1 = vld [vmem:[#allocation2 + $0x634] ss:$248 sps:$4 sm:$0xff]   ;;  %v4720_v2 = vld [vmem:[#allocation2 + $0x618] ss:$248 sps:$4 sm:$0xff]  }
 0x143   :  { %4418 = vmatmul.mubr.msk.bf16.vlgmr.msra.gmra.mrb[12].mxu1 %vm2471_vm2, %v5211_v52  ;;  %4421 = vmatmul.mubr.msk.bf16.vlgmr.msra.gmra.mrb[12].mxu0 %vm2471_vm2, %v5211_v52 }
 0x144   :  { %2599 = vmatpush1.bf16.msra.mxu1 %v4630_v3  ;;  %2722 = vmatpush1.bf16.msra.mxu0 %v4633_v4  ;;  %v4723_v3 = vld [vmem:[#allocation2 + $0x630] ss:$248 sps:$4 sm:$0xff]   ;;  %v4728_v4 = vld [vmem:[#allocation2 + $0x5c] ss:$248 sps:$4 sm:$0xff]  }
 0x145   :  { %2600 = vmatprep.subr.bf16.mxu1 %v4638_v5  ;;  %2723 = vmatprep.subr.bf16.mxu0 %v4641_v6  ;;  %v4731_v5 = vld [vmem:[#allocation2 + $0x74] ss:$248 sps:$4 sm:$0xff]   ;;  %v4726_v6 = vld [vmem:[#allocation2 + $0x58] ss:$248 sps:$4 sm:$0xff]  }
 0x146   :  { %2630 = vmatprep.mubr.bf16.mxu1 %v5008_v23  ;;  %2753 = vmatprep.mubr.bf16.mxu0 %v5008_v23 }
 0x148   :  { %2601 = vmatpush1.bf16.msra.mxu1 %v4636_v7  ;;  %2724 = vmatpush1.bf16.msra.mxu0 %v4639_v8  ;;  %v4729_v7 = vld [vmem:[#allocation2 + $0x70] ss:$248 sps:$4 sm:$0xff]   ;;  %v4734_v8 = vld [vmem:[#allocation2 + $0x24c] ss:$248 sps:$4 sm:$0xff]  }
 0x149   :  { %2602 = vmatprep.subr.bf16.mxu1 %v4644_v9  ;;  %2725 = vmatprep.subr.bf16.mxu0 %v4647_v10  ;;  %v4737_v9 = vld [vmem:[#allocation2 + $0x264] ss:$248 sps:$4 sm:$0xff]   ;;  %v4732_v10 = vld [vmem:[#allocation2 + $0x248] ss:$248 sps:$4 sm:$0xff]  }
 0x14c   :  { %2603 = vmatpush1.bf16.msra.mxu1 %v4642_v11  ;;  %2726 = vmatpush1.bf16.msra.mxu0 %v4645_v12  ;;  %v4735_v11 = vld [vmem:[#allocation2 + $0x260] ss:$248 sps:$4 sm:$0xff]   ;;  %v4740_v12 = vld [vmem:[#allocation2 + $0x43c] ss:$248 sps:$4 sm:$0xff]  }
 0x14d   :  { %2604 = vmatprep.subr.bf16.mxu1 %v4650_v13  ;;  %2727 = vmatprep.subr.bf16.mxu0 %v4653_v14  ;;  %v4743_v13 = vld [vmem:[#allocation2 + $0x454] ss:$248 sps:$4 sm:$0xff]   ;;  %v4738_v14 = vld [vmem:[#allocation2 + $0x438] ss:$248 sps:$4 sm:$0xff]  }
 0x150   :  { %2605 = vmatpush1.bf16.msra.mxu1 %v4648_v15  ;;  %2728 = vmatpush1.bf16.msra.mxu0 %v4651_v16  ;;  %v4741_v15 = vld [vmem:[#allocation2 + $0x450] ss:$248 sps:$4 sm:$0xff]   ;;  %v4746_v16 = vld [vmem:[#allocation2 + $0x62c] ss:$248 sps:$4 sm:$0xff]  }
 0x151   :  { %2680 = vmatprep.subr.bf16.mxu1 %v4656_v17  ;;  %2803 = vmatprep.subr.bf16.mxu0 %v4659_v18  ;;  %v4749_v17 = vld [vmem:[#allocation2 + $0x644] ss:$248 sps:$4 sm:$0xff]   ;;  %v4744_v18 = vld [vmem:[#allocation2 + $0x628] ss:$248 sps:$4 sm:$0xff]  }
 0x153   :  { %4420 = vmatmul.mubr.msk.bf16.vlgmr.msra.gmra.mrb[16].mxu1 %vm2471_vm2, %v5211_v52  ;;  %4423 = vmatmul.mubr.msk.bf16.vlgmr.msra.gmra.mrb[16].mxu0 %vm2471_vm2, %v5211_v52 }
 0x154   :  { %2681 = vmatpush1.bf16.msra.mxu1 %v4654_v19  ;;  %2804 = vmatpush1.bf16.msra.mxu0 %v4657_v20  ;;  %v4747_v19 = vld [vmem:[#allocation2 + $0x640] ss:$248 sps:$4 sm:$0xff]   ;;  %v4752_v20 = vld [vmem:[#allocation2 + $0x6c] ss:$248 sps:$4 sm:$0xff]  }
 0x155   :  { %2682 = vmatprep.subr.bf16.mxu1 %v4662_v21  ;;  %2805 = vmatprep.subr.bf16.mxu0 %v4665_v22  ;;  %v4755_v21 = vld [vmem:[#allocation2 + $0x84] ss:$248 sps:$4 sm:$0xff]   ;;  %v4750_v22 = vld [vmem:[#allocation2 + $0x68] ss:$248 sps:$4 sm:$0xff]  }
 0x156   :  { %2712 = vmatprep.mubr.bf16.mxu1 %v5008_v23  ;;  %2835 = vmatprep.mubr.bf16.mxu0 %v5008_v23 }
 0x158   :  { %2683 = vmatpush1.bf16.msra.mxu1 %v4660_v24  ;;  %2806 = vmatpush1.bf16.msra.mxu0 %v4663_v25  ;;  %v4753_v24 = vld [vmem:[#allocation2 + $0x80] ss:$248 sps:$4 sm:$0xff]   ;;  %v4758_v25 = vld [vmem:[#allocation2 + $0x25c] ss:$248 sps:$4 sm:$0xff]  }
 0x159   :  { %2684 = vmatprep.subr.bf16.mxu1 %v4668_v26  ;;  %2807 = vmatprep.subr.bf16.mxu0 %v4671_v27  ;;  %v4761_v26 = vld [vmem:[#allocation2 + $0x274] ss:$248 sps:$4 sm:$0xff]   ;;  %v4756_v27 = vld [vmem:[#allocation2 + $0x258] ss:$248 sps:$4 sm:$0xff]  }
 0x15c   :  { %2685 = vmatpush1.bf16.msra.mxu1 %v4666_v28  ;;  %2808 = vmatpush1.bf16.msra.mxu0 %v4669_v30  ;;  %v4759_v28 = vld [vmem:[#allocation2 + $0x270] ss:$248 sps:$4 sm:$0xff]   ;;  %v4764_v30 = vld [vmem:[#allocation2 + $0x44c] ss:$248 sps:$4 sm:$0xff]  }
 0x15d   :  { %2686 = vmatprep.subr.bf16.mxu1 %v4674_v31  ;;  %2809 = vmatprep.subr.bf16.mxu0 %v4677_v32  ;;  %v4767_v31 = vld [vmem:[#allocation2 + $0x464] ss:$248 sps:$4 sm:$0xff]   ;;  %v4762_v32 = vld [vmem:[#allocation2 + $0x448] ss:$248 sps:$4 sm:$0xff]  }
 0x160   :  { %2687 = vmatpush1.bf16.msra.mxu1 %v4672_v33  ;;  %2810 = vmatpush1.bf16.msra.mxu0 %v4675_v34  ;;  %v4765_v33 = vld [vmem:[#allocation2 + $0x460] ss:$248 sps:$4 sm:$0xff]   ;;  %v4770_v34 = vld [vmem:[#allocation2 + $0x63c] ss:$248 sps:$4 sm:$0xff]  }
 0x161   :  { %2762 = vmatprep.subr.bf16.mxu1 %v4680_v35  ;;  %2885 = vmatprep.subr.bf16.mxu0 %v4683_v36  ;;  %v4773_v35 = vld [vmem:[#allocation2 + $0x654] ss:$248 sps:$4 sm:$0xff]   ;;  %v4768_v36 = vld [vmem:[#allocation2 + $0x638] ss:$248 sps:$4 sm:$0xff]  }
 0x163   :  { %4422 = vmatmul.mubr.msk.bf16.vlgmr.msra.gmra.mrb[20].mxu1 %vm2471_vm2, %v5211_v52  ;;  %4425 = vmatmul.mubr.msk.bf16.vlgmr.msra.gmra.mrb[20].mxu0 %vm2471_vm2, %v5211_v52 }
 0x164   :  { %2763 = vmatpush1.bf16.msra.mxu1 %v4678_v37  ;;  %2886 = vmatpush1.bf16.msra.mxu0 %v4681_v38  ;;  %v4771_v37 = vld [vmem:[#allocation2 + $0x650] ss:$248 sps:$4 sm:$0xff]   ;;  %v4776_v38 = vld [vmem:[#allocation2 + $0x7c] ss:$248 sps:$4 sm:$0xff]  }
 0x165   :  { %2764 = vmatprep.subr.bf16.mxu1 %v4686_v39  ;;  %2887 = vmatprep.subr.bf16.mxu0 %v4689_v40  ;;  %v4779_v39 = vld [vmem:[#allocation2 + $0x94] ss:$248 sps:$4 sm:$0xff]   ;;  %v4774_v40 = vld [vmem:[#allocation2 + $0x78] ss:$248 sps:$4 sm:$0xff]  }
 0x166   :  { %2794 = vmatprep.mubr.bf16.mxu1 %v5008_v23  ;;  %2917 = vmatprep.mubr.bf16.mxu0 %v5008_v23 }
 0x168   :  { %2765 = vmatpush1.bf16.msra.mxu1 %v4684_v41  ;;  %2888 = vmatpush1.bf16.msra.mxu0 %v4687_v42  ;;  %v4777_v41 = vld [vmem:[#allocation2 + $0x90] ss:$248 sps:$4 sm:$0xff]   ;;  %v4782_v42 = vld [vmem:[#allocation2 + $0x26c] ss:$248 sps:$4 sm:$0xff]  }
 0x169   :  { %2766 = vmatprep.subr.bf16.mxu1 %v4692_v43  ;;  %2889 = vmatprep.subr.bf16.mxu0 %v4695_v44  ;;  %v4785_v43 = vld [vmem:[#allocation2 + $0x284] ss:$248 sps:$4 sm:$0xff]   ;;  %v4780_v44 = vld [vmem:[#allocation2 + $0x268] ss:$248 sps:$4 sm:$0xff]  }
 0x16c   :  { %2767 = vmatpush1.bf16.msra.mxu1 %v4690_v45  ;;  %2890 = vmatpush1.bf16.msra.mxu0 %v4693_v46  ;;  %v4783_v45 = vld [vmem:[#allocation2 + $0x280] ss:$248 sps:$4 sm:$0xff]   ;;  %v4788_v46 = vld [vmem:[#allocation2 + $0x45c] ss:$248 sps:$4 sm:$0xff]  }
 0x16d   :  { %2768 = vmatprep.subr.bf16.mxu1 %v4698_v47  ;;  %2891 = vmatprep.subr.bf16.mxu0 %v4701_v48  ;;  %v4791_v47 = vld [vmem:[#allocation2 + $0x474] ss:$248 sps:$4 sm:$0xff]   ;;  %v4786_v48 = vld [vmem:[#allocation2 + $0x458] ss:$248 sps:$4 sm:$0xff]  }
 0x170   :  { %2769 = vmatpush1.bf16.msra.mxu1 %v4696_v49  ;;  %2892 = vmatpush1.bf16.msra.mxu0 %v4699_v50  ;;  %v4789_v49 = vld [vmem:[#allocation2 + $0x470] ss:$248 sps:$4 sm:$0xff]   ;;  %v4794_v50 = vld [vmem:[#allocation2 + $0x64c] ss:$248 sps:$4 sm:$0xff]  }
 0x171   :  { %2844 = vmatprep.subr.bf16.mxu1 %v4704_v51  ;;  %2967 = vmatprep.subr.bf16.mxu0 %v4707_v53  ;;  %v4797_v51 = vld [vmem:[#allocation2 + $0x664] ss:$248 sps:$4 sm:$0xff]   ;;  %v4792_v53 = vld [vmem:[#allocation2 + $0x648] ss:$248 sps:$4 sm:$0xff]  }
 0x173   :  { %4424 = vmatmul.mubr.msk.bf16.vlgmr.msra.gmra.mrb[24].mxu1 %vm2471_vm2, %v5211_v52  ;;  %4427 = vmatmul.mubr.msk.bf16.vlgmr.msra.gmra.mrb[24].mxu0 %vm2471_vm2, %v5211_v52 }
 0x174   :  { %2845 = vmatpush1.bf16.msra.mxu1 %v4702_v54  ;;  %2968 = vmatpush1.bf16.msra.mxu0 %v4705_v55  ;;  %v4795_v54 = vld [vmem:[#allocation2 + $0x660] ss:$248 sps:$4 sm:$0xff]   ;;  %v4800_v55 = vld [vmem:[#allocation2 + $0x8c] ss:$248 sps:$4 sm:$0xff]  }
 0x175   :  { %2846 = vmatprep.subr.bf16.mxu1 %v4710_v56  ;;  %2969 = vmatprep.subr.bf16.mxu0 %v4713_v57  ;;  %v4803_v56 = vld [vmem:[#allocation2 + $0xa4] ss:$248 sps:$4 sm:$0xff]   ;;  %v4798_v57 = vld [vmem:[#allocation2 + $0x88] ss:$248 sps:$4 sm:$0xff]  }
 0x176   :  { %2876 = vmatprep.mubr.bf16.mxu1 %v5008_v23  ;;  %2999 = vmatprep.mubr.bf16.mxu0 %v5008_v23 }
 0x178   :  { %2847 = vmatpush1.bf16.msra.mxu1 %v4708_v58  ;;  %2970 = vmatpush1.bf16.msra.mxu0 %v4711_v59  ;;  %v4801_v58 = vld [vmem:[#allocation2 + $0xa0] ss:$248 sps:$4 sm:$0xff]   ;;  %v4806_v59 = vld [vmem:[#allocation2 + $0x27c] ss:$248 sps:$4 sm:$0xff]  }
 0x179   :  { %2848 = vmatprep.subr.bf16.mxu1 %v4716_v60  ;;  %2971 = vmatprep.subr.bf16.mxu0 %v4719_v61  ;;  %v4809_v60 = vld [vmem:[#allocation2 + $0x294] ss:$248 sps:$4 sm:$0xff]   ;;  %v4804_v61 = vld [vmem:[#allocation2 + $0x278] ss:$248 sps:$4 sm:$0xff]  }
 0x17c   :  { %2849 = vmatpush1.bf16.msra.mxu1 %v4714_v62  ;;  %2972 = vmatpush1.bf16.msra.mxu0 %v4717_v63  ;;  %v4807_v62 = vld [vmem:[#allocation2 + $0x290] ss:$248 sps:$4 sm:$0xff]   ;;  %v4812_v63 = vld [vmem:[#allocation2 + $0x46c] ss:$248 sps:$4 sm:$0xff]  }
 0x17d   :  { %2850 = vmatprep.subr.bf16.mxu1 %v4722_v0  ;;  %2973 = vmatprep.subr.bf16.mxu0 %v4725_v1  ;;  %v4815_v0 = vld [vmem:[#allocation2 + $0x484] ss:$248 sps:$4 sm:$0xff]   ;;  %v4810_v1 = vld [vmem:[#allocation2 + $0x468] ss:$248 sps:$4 sm:$0xff]  }
 0x180   :  { %2851 = vmatpush1.bf16.msra.mxu1 %v4720_v2  ;;  %2974 = vmatpush1.bf16.msra.mxu0 %v4723_v3  ;;  %v4813_v2 = vld [vmem:[#allocation2 + $0x480] ss:$248 sps:$4 sm:$0xff]   ;;  %v4818_v3 = vld [vmem:[#allocation2 + $0x65c] ss:$248 sps:$4 sm:$0xff]  }
 0x181   :  { %2926 = vmatprep.subr.bf16.mxu1 %v4728_v4  ;;  %3049 = vmatprep.subr.bf16.mxu0 %v4731_v5  ;;  %v4821_v4 = vld [vmem:[#allocation2 + $0x674] ss:$248 sps:$4 sm:$0xff]   ;;  %v4816_v5 = vld [vmem:[#allocation2 + $0x658] ss:$248 sps:$4 sm:$0xff]  }
 0x183   :  { %4426 = vmatmul.mubr.msk.bf16.vlgmr.msra.gmra.mrb[28].mxu1 %vm2471_vm2, %v5211_v52  ;;  %4429 = vmatmul.mubr.msk.bf16.vlgmr.msra.gmra.mrb[28].mxu0 %vm2471_vm2, %v5211_v52 }
 0x184   :  { %2927 = vmatpush1.bf16.msra.mxu1 %v4726_v6  ;;  %3050 = vmatpush1.bf16.msra.mxu0 %v4729_v7  ;;  %v4819_v6 = vld [vmem:[#allocation2 + $0x670] ss:$248 sps:$4 sm:$0xff]   ;;  %v4824_v7 = vld [vmem:[#allocation2 + $0x9c] ss:$248 sps:$4 sm:$0xff]  }
 0x185   :  { %2928 = vmatprep.subr.bf16.mxu1 %v4734_v8  ;;  %3051 = vmatprep.subr.bf16.mxu0 %v4737_v9  ;;  %v4827_v8 = vld [vmem:[#allocation2 + $0xb4] ss:$248 sps:$4 sm:$0xff]   ;;  %v4822_v9 = vld [vmem:[#allocation2 + $0x98] ss:$248 sps:$4 sm:$0xff]  }
 0x186   :  { %2958 = vmatprep.mubr.bf16.mxu1 %v5008_v23  ;;  %3081 = vmatprep.mubr.bf16.mxu0 %v5008_v23 }
 0x188   :  { %2929 = vmatpush1.bf16.msra.mxu1 %v4732_v10  ;;  %3052 = vmatpush1.bf16.msra.mxu0 %v4735_v11  ;;  %v4825_v10 = vld [vmem:[#allocation2 + $0xb0] ss:$248 sps:$4 sm:$0xff]   ;;  %v4830_v11 = vld [vmem:[#allocation2 + $0x28c] ss:$248 sps:$4 sm:$0xff]  }
 0x189   :  { %2930 = vmatprep.subr.bf16.mxu1 %v4740_v12  ;;  %3053 = vmatprep.subr.bf16.mxu0 %v4743_v13  ;;  %v4833_v12 = vld [vmem:[#allocation2 + $0x2a4] ss:$248 sps:$4 sm:$0xff]   ;;  %v4828_v13 = vld [vmem:[#allocation2 + $0x288] ss:$248 sps:$4 sm:$0xff]  }
 0x18c   :  { %2931 = vmatpush1.bf16.msra.mxu1 %v4738_v14  ;;  %3054 = vmatpush1.bf16.msra.mxu0 %v4741_v15  ;;  %v4831_v14 = vld [vmem:[#allocation2 + $0x2a0] ss:$248 sps:$4 sm:$0xff]   ;;  %v4836_v15 = vld [vmem:[#allocation2 + $0x47c] ss:$248 sps:$4 sm:$0xff]  }
 0x18d   :  { %2932 = vmatprep.subr.bf16.mxu1 %v4746_v16  ;;  %3055 = vmatprep.subr.bf16.mxu0 %v4749_v17  ;;  %v4839_v16 = vld [vmem:[#allocation2 + $0x494] ss:$248 sps:$4 sm:$0xff]   ;;  %v4834_v17 = vld [vmem:[#allocation2 + $0x478] ss:$248 sps:$4 sm:$0xff]  }
 0x190   :  { %2933 = vmatpush1.bf16.msra.mxu1 %v4744_v18  ;;  %3056 = vmatpush1.bf16.msra.mxu0 %v4747_v19  ;;  %v4837_v18 = vld [vmem:[#allocation2 + $0x490] ss:$248 sps:$4 sm:$0xff]   ;;  %v4842_v19 = vld [vmem:[#allocation2 + $0x66c] ss:$248 sps:$4 sm:$0xff]  }
 0x191   :  { %3008 = vmatprep.subr.bf16.mxu1 %v4752_v20  ;;  %3131 = vmatprep.subr.bf16.mxu0 %v4755_v21  ;;  %v4845_v20 = vld [vmem:[#allocation2 + $0x684] ss:$248 sps:$4 sm:$0xff]   ;;  %v4840_v21 = vld [vmem:[#allocation2 + $0x668] ss:$248 sps:$4 sm:$0xff]  }
 0x193   :  { %4428 = vmatmul.mubr.msk.bf16.vlgmr.msra.gmra.mrb[32].mxu1 %vm2471_vm2, %v5211_v52  ;;  %4431 = vmatmul.mubr.msk.bf16.vlgmr.msra.gmra.mrb[32].mxu0 %vm2471_vm2, %v5211_v52 }
 0x194   :  { %3009 = vmatpush1.bf16.msra.mxu1 %v4750_v22  ;;  %3132 = vmatpush1.bf16.msra.mxu0 %v4753_v24  ;;  %v4843_v22 = vld [vmem:[#allocation2 + $0x680] ss:$248 sps:$4 sm:$0xff]   ;;  %v4848_v24 = vld [vmem:[#allocation2 + $0xac] ss:$248 sps:$4 sm:$0xff]  }
 0x195   :  { %3010 = vmatprep.subr.bf16.mxu1 %v4758_v25  ;;  %3133 = vmatprep.subr.bf16.mxu0 %v4761_v26  ;;  %v4851_v25 = vld [vmem:[#allocation2 + $0xc4] ss:$248 sps:$4 sm:$0xff]   ;;  %v4846_v26 = vld [vmem:[#allocation2 + $0xa8] ss:$248 sps:$4 sm:$0xff]  }
 0x196   :  { %3040 = vmatprep.mubr.bf16.mxu1 %v5008_v23  ;;  %3163 = vmatprep.mubr.bf16.mxu0 %v5008_v23 }
 0x198   :  { %3011 = vmatpush1.bf16.msra.mxu1 %v4756_v27  ;;  %3134 = vmatpush1.bf16.msra.mxu0 %v4759_v28  ;;  %v4849_v27 = vld [vmem:[#allocation2 + $0xc0] ss:$248 sps:$4 sm:$0xff]   ;;  %v4854_v28 = vld [vmem:[#allocation2 + $0x29c] ss:$248 sps:$4 sm:$0xff]  }
 0x199   :  { %3012 = vmatprep.subr.bf16.mxu1 %v4764_v30  ;;  %3135 = vmatprep.subr.bf16.mxu0 %v4767_v31  ;;  %v4857_v30 = vld [vmem:[#allocation2 + $0x2b4] ss:$248 sps:$4 sm:$0xff]   ;;  %v4852_v31 = vld [vmem:[#allocation2 + $0x298] ss:$248 sps:$4 sm:$0xff]  }
 0x19c   :  { %3013 = vmatpush1.bf16.msra.mxu1 %v4762_v32  ;;  %3136 = vmatpush1.bf16.msra.mxu0 %v4765_v33  ;;  %v4855_v32 = vld [vmem:[#allocation2 + $0x2b0] ss:$248 sps:$4 sm:$0xff]   ;;  %v4860_v33 = vld [vmem:[#allocation2 + $0x48c] ss:$248 sps:$4 sm:$0xff]  }
 0x19d   :  { %3014 = vmatprep.subr.bf16.mxu1 %v4770_v34  ;;  %3137 = vmatprep.subr.bf16.mxu0 %v4773_v35  ;;  %v4863_v34 = vld [vmem:[#allocation2 + $0x4a4] ss:$248 sps:$4 sm:$0xff]   ;;  %v4858_v35 = vld [vmem:[#allocation2 + $0x488] ss:$248 sps:$4 sm:$0xff]  }
 0x1a0   :  { %3015 = vmatpush1.bf16.msra.mxu1 %v4768_v36  ;;  %3138 = vmatpush1.bf16.msra.mxu0 %v4771_v37  ;;  %v4861_v36 = vld [vmem:[#allocation2 + $0x4a0] ss:$248 sps:$4 sm:$0xff]   ;;  %v4866_v37 = vld [vmem:[#allocation2 + $0x67c] ss:$248 sps:$4 sm:$0xff]  }
 0x1a1   :  { %3090 = vmatprep.subr.bf16.mxu1 %v4776_v38  ;;  %3213 = vmatprep.subr.bf16.mxu0 %v4779_v39  ;;  %v4869_v38 = vld [vmem:[#allocation2 + $0x694] ss:$248 sps:$4 sm:$0xff]   ;;  %v4864_v39 = vld [vmem:[#allocation2 + $0x678] ss:$248 sps:$4 sm:$0xff]  }
 0x1a3   :  { %4430 = vmatmul.mubr.msk.bf16.vlgmr.msra.gmra.mrb[36].mxu1 %vm2471_vm2, %v5211_v52  ;;  %4433 = vmatmul.mubr.msk.bf16.vlgmr.msra.gmra.mrb[36].mxu0 %vm2471_vm2, %v5211_v52 }
 0x1a4   :  { %3091 = vmatpush1.bf16.msra.mxu1 %v4774_v40  ;;  %3214 = vmatpush1.bf16.msra.mxu0 %v4777_v41  ;;  %v4867_v40 = vld [vmem:[#allocation2 + $0x690] ss:$248 sps:$4 sm:$0xff]   ;;  %v4872_v41 = vld [vmem:[#allocation2 + $0xbc] ss:$248 sps:$4 sm:$0xff]  }
 0x1a5   :  { %3092 = vmatprep.subr.bf16.mxu1 %v4782_v42  ;;  %3215 = vmatprep.subr.bf16.mxu0 %v4785_v43  ;;  %v4875_v42 = vld [vmem:[#allocation2 + $0xd4] ss:$248 sps:$4 sm:$0xff]   ;;  %v4870_v43 = vld [vmem:[#allocation2 + $0xb8] ss:$248 sps:$4 sm:$0xff]  }
 0x1a6   :  { %3122 = vmatprep.mubr.bf16.mxu1 %v5008_v23  ;;  %3245 = vmatprep.mubr.bf16.mxu0 %v5008_v23 }
 0x1a8   :  { %3093 = vmatpush1.bf16.msra.mxu1 %v4780_v44  ;;  %3216 = vmatpush1.bf16.msra.mxu0 %v4783_v45  ;;  %v4873_v44 = vld [vmem:[#allocation2 + $0xd0] ss:$248 sps:$4 sm:$0xff]   ;;  %v4878_v45 = vld [vmem:[#allocation2 + $0x2ac] ss:$248 sps:$4 sm:$0xff]  }
 0x1a9   :  { %3094 = vmatprep.subr.bf16.mxu1 %v4788_v46  ;;  %3217 = vmatprep.subr.bf16.mxu0 %v4791_v47  ;;  %v4881_v46 = vld [vmem:[#allocation2 + $0x2c4] ss:$248 sps:$4 sm:$0xff]   ;;  %v4876_v47 = vld [vmem:[#allocation2 + $0x2a8] ss:$248 sps:$4 sm:$0xff]  }
 0x1ac   :  { %3095 = vmatpush1.bf16.msra.mxu1 %v4786_v48  ;;  %3218 = vmatpush1.bf16.msra.mxu0 %v4789_v49  ;;  %v4879_v48 = vld [vmem:[#allocation2 + $0x2c0] ss:$248 sps:$4 sm:$0xff]   ;;  %v4884_v49 = vld [vmem:[#allocation2 + $0x49c] ss:$248 sps:$4 sm:$0xff]  }
 0x1ad   :  { %3096 = vmatprep.subr.bf16.mxu1 %v4794_v50  ;;  %3219 = vmatprep.subr.bf16.mxu0 %v4797_v51  ;;  %v4887_v50 = vld [vmem:[#allocation2 + $0x4b4] ss:$248 sps:$4 sm:$0xff]   ;;  %v4882_v51 = vld [vmem:[#allocation2 + $0x498] ss:$248 sps:$4 sm:$0xff]  }
 0x1b0   :  { %3097 = vmatpush1.bf16.msra.mxu1 %v4792_v53  ;;  %3220 = vmatpush1.bf16.msra.mxu0 %v4795_v54  ;;  %v4885_v53 = vld [vmem:[#allocation2 + $0x4b0] ss:$248 sps:$4 sm:$0xff]   ;;  %v4890_v54 = vld [vmem:[#allocation2 + $0x68c] ss:$248 sps:$4 sm:$0xff]  }
 0x1b1   :  { %3172 = vmatprep.subr.bf16.mxu1 %v4800_v55  ;;  %3295 = vmatprep.subr.bf16.mxu0 %v4803_v56  ;;  %v4893_v55 = vld [vmem:[#allocation2 + $0x6a4] ss:$248 sps:$4 sm:$0xff]   ;;  %v4888_v56 = vld [vmem:[#allocation2 + $0x688] ss:$248 sps:$4 sm:$0xff]  }
 0x1b3   :  { %4432 = vmatmul.mubr.msk.bf16.vlgmr.msra.gmra.mrb[40].mxu1 %vm2471_vm2, %v5211_v52  ;;  %4435 = vmatmul.mubr.msk.bf16.vlgmr.msra.gmra.mrb[40].mxu0 %vm2471_vm2, %v5211_v52 }
 0x1b4   :  { %3173 = vmatpush1.bf16.msra.mxu1 %v4798_v57  ;;  %3296 = vmatpush1.bf16.msra.mxu0 %v4801_v58  ;;  %v4891_v57 = vld [vmem:[#allocation2 + $0x6a0] ss:$248 sps:$4 sm:$0xff]   ;;  %v4896_v58 = vld [vmem:[#allocation2 + $0xcc] ss:$248 sps:$4 sm:$0xff]  }
 0x1b5   :  { %3174 = vmatprep.subr.bf16.mxu1 %v4806_v59  ;;  %3297 = vmatprep.subr.bf16.mxu0 %v4809_v60  ;;  %v4899_v59 = vld [vmem:[#allocation2 + $0xe4] ss:$248 sps:$4 sm:$0xff]   ;;  %v4894_v60 = vld [vmem:[#allocation2 + $0xc8] ss:$248 sps:$4 sm:$0xff]  }
 0x1b6   :  { %3204 = vmatprep.mubr.bf16.mxu1 %v5008_v23  ;;  %3327 = vmatprep.mubr.bf16.mxu0 %v5008_v23 }
 0x1b8   :  { %3175 = vmatpush1.bf16.msra.mxu1 %v4804_v61  ;;  %3298 = vmatpush1.bf16.msra.mxu0 %v4807_v62  ;;  %v4897_v61 = vld [vmem:[#allocation2 + $0xe0] ss:$248 sps:$4 sm:$0xff]   ;;  %v4902_v62 = vld [vmem:[#allocation2 + $0x2bc] ss:$248 sps:$4 sm:$0xff]  }
 0x1b9   :  { %3176 = vmatprep.subr.bf16.mxu1 %v4812_v63  ;;  %3299 = vmatprep.subr.bf16.mxu0 %v4815_v0  ;;  %v4905_v63 = vld [vmem:[#allocation2 + $0x2d4] ss:$248 sps:$4 sm:$0xff]   ;;  %v4900_v0 = vld [vmem:[#allocation2 + $0x2b8] ss:$248 sps:$4 sm:$0xff]  }
 0x1bc   :  { %3177 = vmatpush1.bf16.msra.mxu1 %v4810_v1  ;;  %3300 = vmatpush1.bf16.msra.mxu0 %v4813_v2  ;;  %v4903_v1 = vld [vmem:[#allocation2 + $0x2d0] ss:$248 sps:$4 sm:$0xff]   ;;  %v4908_v2 = vld [vmem:[#allocation2 + $0x4ac] ss:$248 sps:$4 sm:$0xff]  }
 0x1bd   :  { %3178 = vmatprep.subr.bf16.mxu1 %v4818_v3  ;;  %3301 = vmatprep.subr.bf16.mxu0 %v4821_v4  ;;  %v4911_v3 = vld [vmem:[#allocation2 + $0x4c4] ss:$248 sps:$4 sm:$0xff]   ;;  %v4906_v4 = vld [vmem:[#allocation2 + $0x4a8] ss:$248 sps:$4 sm:$0xff]  }
 0x1c0   :  { %3179 = vmatpush1.bf16.msra.mxu1 %v4816_v5  ;;  %3302 = vmatpush1.bf16.msra.mxu0 %v4819_v6  ;;  %v4909_v5 = vld [vmem:[#allocation2 + $0x4c0] ss:$248 sps:$4 sm:$0xff]   ;;  %v4914_v6 = vld [vmem:[#allocation2 + $0x69c] ss:$248 sps:$4 sm:$0xff]  }
 0x1c1   :  { %3254 = vmatprep.subr.bf16.mxu1 %v4824_v7  ;;  %3377 = vmatprep.subr.bf16.mxu0 %v4827_v8  ;;  %v4917_v7 = vld [vmem:[#allocation2 + $0x6b4] ss:$248 sps:$4 sm:$0xff]   ;;  %v4912_v8 = vld [vmem:[#allocation2 + $0x698] ss:$248 sps:$4 sm:$0xff]  }
 0x1c3   :  { %4434 = vmatmul.mubr.msk.bf16.vlgmr.msra.gmra.mrb[44].mxu1 %vm2471_vm2, %v5211_v52  ;;  %4437 = vmatmul.mubr.msk.bf16.vlgmr.msra.gmra.mrb[44].mxu0 %vm2471_vm2, %v5211_v52 }
 0x1c4   :  { %3255 = vmatpush1.bf16.msra.mxu1 %v4822_v9  ;;  %3378 = vmatpush1.bf16.msra.mxu0 %v4825_v10  ;;  %v4915_v9 = vld [vmem:[#allocation2 + $0x6b0] ss:$248 sps:$4 sm:$0xff]   ;;  %v4920_v10 = vld [vmem:[#allocation2 + $0xdc] ss:$248 sps:$4 sm:$0xff]  }
 0x1c5   :  { %3256 = vmatprep.subr.bf16.mxu1 %v4830_v11  ;;  %3379 = vmatprep.subr.bf16.mxu0 %v4833_v12  ;;  %v4923_v11 = vld [vmem:[#allocation2 + $0xf4] ss:$248 sps:$4 sm:$0xff]   ;;  %v4918_v12 = vld [vmem:[#allocation2 + $0xd8] ss:$248 sps:$4 sm:$0xff]  }
 0x1c6   :  { %3286 = vmatprep.mubr.bf16.mxu1 %v5008_v23  ;;  %3409 = vmatprep.mubr.bf16.mxu0 %v5008_v23 }
 0x1c8   :  { %3257 = vmatpush1.bf16.msra.mxu1 %v4828_v13  ;;  %3380 = vmatpush1.bf16.msra.mxu0 %v4831_v14  ;;  %v5292_v13 = vsub.s32 0, %v5128_v29  ;;  %v5295_v14 = vsub.s32 4, %v5128_v29 }
 0x1c9   :  { %3258 = vmatprep.subr.bf16.mxu1 %v4836_v15  ;;  %3381 = vmatprep.subr.bf16.mxu0 %v4839_v16  ;;  %v4921_v15 = vld [vmem:[#allocation2 + $0xf0] ss:$248 sps:$4 sm:$0xff]   ;;  %v5300_v16 = vld [vmem:[%s5554_s4] sm:$0xff] }
 0x1cc   :  { %3259 = vmatpush1.bf16.msra.mxu1 %v4834_v17  ;;  %3382 = vmatpush1.bf16.msra.mxu0 %v4837_v18  ;;  %v5303_v17 = vsub.s32 1, %v5128_v29  ;;  %v5306_v18 = vsub.s32 5, %v5128_v29 }
 0x1cd   :  { %3260 = vmatprep.subr.bf16.mxu1 %v4842_v19  ;;  %3383 = vmatprep.subr.bf16.mxu0 %v4845_v20  ;;  %v4926_v19 = vld [vmem:[#allocation2 + $0x2cc] ss:$248 sps:$4 sm:$0xff]  }
 0x1ce   :  { %v4929_v20 = vld [vmem:[#allocation2 + $0x2e4] ss:$248 sps:$4 sm:$0xff]  }
 0x1d0   :  { %3261 = vmatpush1.bf16.msra.mxu1 %v4840_v21  ;;  %3384 = vmatpush1.bf16.msra.mxu0 %v4843_v22  ;;  %v924_v21 = vrot.slane %v5300_v16, %v5292_v13  ;;  %v940_v22 = vrot.slane %v5300_v16, %v5295_v14 }
 0x1d1   :  { %3336 = vmatprep.subr.bf16.mxu1 %v4848_v24  ;;  %3459 = vmatprep.subr.bf16.mxu0 %v4851_v25  ;;  %v4924_v24 = vld [vmem:[#allocation2 + $0x2c8] ss:$248 sps:$4 sm:$0xff]  }
 0x1d2   :  { %v4927_v25 = vld [vmem:[#allocation2 + $0x2e0] ss:$248 sps:$4 sm:$0xff]  }
 0x1d3   :  { %4436 = vmatmul.mubr.msk.bf16.vlgmr.msra.gmra.mrb[48].mxu1 %vm2471_vm2, %v5211_v52  ;;  %4439 = vmatmul.mubr.msk.bf16.vlgmr.msra.gmra.mrb[48].mxu0 %vm2471_vm2, %v5211_v52 }
 0x1d4   :  { %3337 = vmatpush1.bf16.msra.mxu1 %v4846_v26  ;;  %3460 = vmatpush1.bf16.msra.mxu0 %v4849_v27  ;;  %v928_v26 = vrot.slane %v5300_v16, %v5303_v17  ;;  %v944_v27 = vrot.slane %v5300_v16, %v5306_v18 }
 0x1d5   :  { %3338 = vmatprep.subr.bf16.mxu1 %v4854_v28  ;;  %3461 = vmatprep.subr.bf16.mxu0 %v4857_v30  ;;  %v4932_v28 = vld [vmem:[#allocation2 + $0x4bc] ss:$248 sps:$4 sm:$0xff]  }
 0x1d6   :  { %3368 = vmatprep.mubr.bf16.mxu1 %v5008_v23  ;;  %3491 = vmatprep.mubr.bf16.mxu0 %v5008_v23  ;;  %v4935_v30 = vld [vmem:[#allocation2 + $0x4d4] ss:$248 sps:$4 sm:$0xff]  }
 0x1d8   :  { %3339 = vmatpush1.bf16.msra.mxu1 %v4852_v31  ;;  %3462 = vmatpush1.bf16.msra.mxu0 %v4855_v32 }
 0x1d9   :  { %3340 = vmatprep.subr.bf16.mxu1 %v4860_v33  ;;  %3463 = vmatprep.subr.bf16.mxu0 %v4863_v34 }
 0x1dc   :  { %3341 = vmatpush1.bf16.msra.mxu1 %v4858_v35  ;;  %3464 = vmatpush1.bf16.msra.mxu0 %v4861_v36 }
 0x1dd   :  { %3342 = vmatprep.subr.bf16.mxu1 %v4866_v37  ;;  %3465 = vmatprep.subr.bf16.mxu0 %v4869_v38 }
 0x1e0   :  { %3343 = vmatpush1.bf16.msra.mxu1 %v4864_v39  ;;  %3466 = vmatpush1.bf16.msra.mxu0 %v4867_v40 }
 0x1e1   :  { %3418 = vmatprep.subr.bf16.mxu1 %v4872_v41  ;;  %3541 = vmatprep.subr.bf16.mxu0 %v4875_v42  ;;  %v4930_v41 = vld [vmem:[#allocation2 + $0x4b8] ss:$248 sps:$4 sm:$0xff]  }
 0x1e2   :  { %v4933_v42 = vld [vmem:[#allocation2 + $0x4d0] ss:$248 sps:$4 sm:$0xff]  }
 0x1e3   :  { %4438 = vmatmul.mubr.msk.bf16.vlgmr.msra.gmra.mrb[52].mxu1 %vm2471_vm2, %v5211_v52  ;;  %4441 = vmatmul.mubr.msk.bf16.vlgmr.msra.gmra.mrb[52].mxu0 %vm2471_vm2, %v5211_v52 }
 0x1e4   :  { %3419 = vmatpush1.bf16.msra.mxu1 %v4870_v43  ;;  %3542 = vmatpush1.bf16.msra.mxu0 %v4873_v44 }
 0x1e5   :  { %3420 = vmatprep.subr.bf16.mxu1 %v4878_v45  ;;  %3543 = vmatprep.subr.bf16.mxu0 %v4881_v46  ;;  %v4938_v45 = vld [vmem:[#allocation2 + $0x6ac] ss:$248 sps:$4 sm:$0xff]  }
 0x1e6   :  { %3450 = vmatprep.mubr.bf16.mxu1 %v5008_v23  ;;  %3573 = vmatprep.mubr.bf16.mxu0 %v5008_v23  ;;  %v4941_v46 = vld [vmem:[#allocation2 + $0x6c4] ss:$248 sps:$4 sm:$0xff]  }
 0x1e8   :  { %3421 = vmatpush1.bf16.msra.mxu1 %v4876_v47  ;;  %3544 = vmatpush1.bf16.msra.mxu0 %v4879_v48 }
 0x1e9   :  { %3422 = vmatprep.subr.bf16.mxu1 %v4884_v49  ;;  %3545 = vmatprep.subr.bf16.mxu0 %v4887_v50  ;;  %v4936_v49 = vld [vmem:[#allocation2 + $0x6a8] ss:$248 sps:$4 sm:$0xff]  }
 0x1ea   :  { %v4939_v50 = vld [vmem:[#allocation2 + $0x6c0] ss:$248 sps:$4 sm:$0xff]  }
 0x1ec   :  { %3423 = vmatpush1.bf16.msra.mxu1 %v4882_v51  ;;  %3546 = vmatpush1.bf16.msra.mxu0 %v4885_v53  ;;  %v4944_v51 = vld [vmem:[#allocation2 + $0xec] ss:$248 sps:$4 sm:$0xff]   ;;  %v5335_v53 = vsub.s32 2, %v5128_v29 }
 0x1ed   :  { %3424 = vmatprep.subr.bf16.mxu1 %v4890_v54  ;;  %3547 = vmatprep.subr.bf16.mxu0 %v4893_v55  ;;  %v5009_v54 = vmov 1983009808  }
 0x1ee   :  { %v3811_v55 = vunpack.c.l.s4 %v5009_v54 }
 0x1f0   :  { %3425 = vmatpush1.bf16.msra.mxu1 %v4888_v56  ;;  %3548 = vmatpush1.bf16.msra.mxu0 %v4891_v57  ;;  %v4942_v56 = vld [vmem:[#allocation2 + $0xe8] ss:$248 sps:$4 sm:$0xff]  }
 0x1f1   :  { %3500 = vmatprep.subr.bf16.mxu1 %v4896_v58  ;;  %3623 = vmatprep.subr.bf16.mxu0 %v4899_v59  ;;  %v5340_v57 = vld [vmem:[%s5554_s4 + $0x8] sm:$0xff]  ;;  %v5343_v58 = vsub.s32 3, %v5128_v29  ;;  %v4947_v59 = vld [vmem:[#allocation2 + $0x2dc] ss:$248 sps:$4 sm:$0xff]  }
 0x1f3   :  { %4440 = vmatmul.mubr.msk.bf16.vlgmr.msra.gmra.mrb[56].mxu1 %vm2471_vm2, %v5211_v52  ;;  %4443 = vmatmul.mubr.msk.bf16.vlgmr.msra.gmra.mrb[56].mxu0 %vm2471_vm2, %v5211_v52 }
 0x1f4   :  { %3501 = vmatpush1.bf16.msra.mxu1 %v4894_v60  ;;  %3624 = vmatpush1.bf16.msra.mxu0 %v4897_v61  ;;  %v932_v60 = vrot.slane %v5300_v16, %v5335_v53  ;;  %v956_v61 = vrot.slane %v5340_v57, %v5292_v13 }
 0x1f5   :  { %3502 = vmatprep.subr.bf16.mxu1 %v4902_v62  ;;  %3625 = vmatprep.subr.bf16.mxu0 %v4905_v63  ;;  %v3812_v62 = vunpack.c.0.s8 %v3811_v55  ;;  %v936_v63 = vrot.slane %v5300_v16, %v5343_v58  ;;  %v5393_v55 = vld [vmem:[%s5554_s4 + $0x10] sm:$0xff] }
 0x1f6   :  { %3532 = vmatprep.mubr.bf16.mxu1 %v5008_v23  ;;  %3655 = vmatprep.mubr.bf16.mxu0 %v5008_v23 }
 0x1f8   :  { %3503 = vmatpush1.bf16.msra.mxu1 %v4900_v0  ;;  %3626 = vmatpush1.bf16.msra.mxu0 %v4903_v1  ;;  %v960_v0 = vrot.slane %v5340_v57, %v5303_v17  ;;  %v4945_v1 = vld [vmem:[#allocation2 + $0x2d8] ss:$248 sps:$4 sm:$0xff]  }
 0x1f9   :  { %3504 = vmatprep.subr.bf16.mxu1 %v4908_v2  ;;  %3627 = vmatprep.subr.bf16.mxu0 %v4911_v3  ;;  %v4950_v2 = vld [vmem:[#allocation2 + $0x4cc] ss:$248 sps:$4 sm:$0xff]  }
 0x1fc   :  { %3505 = vmatpush1.bf16.msra.mxu1 %v4906_v4  ;;  %3628 = vmatpush1.bf16.msra.mxu0 %v4909_v5 }
 0x1fd   :  { %3506 = vmatprep.subr.bf16.mxu1 %v4914_v6  ;;  %3629 = vmatprep.subr.bf16.mxu0 %v4917_v7 }
 0x200   :  { %3507 = vmatpush1.bf16.msra.mxu1 %v4912_v8  ;;  %3630 = vmatpush1.bf16.msra.mxu0 %v4915_v9  ;;  %v5361_v9 = vsub.s32 %v3812_v62, %v5128_v29 }
 0x201   :  { %3582 = vmatprep.subr.bf16.mxu1 %v4920_v10  ;;  %3705 = vmatprep.subr.bf16.mxu0 %v4923_v11 }
 0x203   :  { %4442 = vmatmul.mubr.msk.bf16.vlgmr.msra.gmra.mrb[60].mxu1 %vm2471_vm2, %v5211_v52  ;;  %4445 = vmatmul.mubr.msk.bf16.vlgmr.msra.gmra.mrb[60].mxu0 %vm2471_vm2, %v5211_v52 }
 0x204   :  { %3583 = vmatpush1.bf16.msra.mxu1 %v4918_v12  ;;  %3706 = vmatpush1.bf16.msra.mxu0 %v4921_v15 }
 0x205   :  { %3584 = vmatprep.subr.bf16.mxu1 %v4926_v19  ;;  %3707 = vmatprep.subr.bf16.mxu0 %v4929_v20  ;;  %v4948_v19 = vld [vmem:[#allocation2 + $0x4c8] ss:$248 sps:$4 sm:$0xff]  }
 0x206   :  { %v2509_v31 = vpop.f32.mrb[8].mxu1  ;;  %v2591_v32 = vpop.f32.mrb[8].mxu0  ;;  %3614 = vmatprep.mubr.bf16.mxu1 %v5008_v23  ;;  %3737 = vmatprep.mubr.bf16.mxu0 %v5008_v23 }
 0x207   :  { %v5322_v33 = vadd.f32 %v2509_v31, %v924_v21  ;;  %v5324_v34 = vadd.f32 %v2591_v32, %v940_v22  ;;  %v2511_v35 = vpop.f32.mrb[9].mxu1  ;;  %v2593_v36 = vpop.f32.mrb[9].mxu0  ;;  %v4953_v21 = vld [vmem:[#allocation2 + $0x6bc] ss:$248 sps:$4 sm:$0xff]   ;;  %v5373_v31 = vsub.s32 7, %v5128_v29 }
 0x208   :  { %v5326_v37 = vadd.f32 %v2511_v35, %v928_v26  ;;  %v5328_v38 = vadd.f32 %v2593_v36, %v944_v27  ;;  %3585 = vmatpush1.bf16.msra.mxu1 %v4924_v24  ;;  %3708 = vmatpush1.bf16.msra.mxu0 %v4927_v25  ;;  %v2513_v39 = vpop.f32.mrb[10].mxu1  ;;  %v2595_v40 = vpop.f32.mrb[10].mxu0  ;;  %v4951_v27 = vld [vmem:[#allocation2 + $0x6b8] ss:$248 sps:$4 sm:$0xff]   ;;  %v976_v36 = vrot.slane %v5340_v57, %v5306_v18 }
 0x209   :  { %v2514_v43 = vpop.f32.mrb[11].mxu1  ;;  %v2596_v44 = vpop.f32.mrb[11].mxu0  ;;  %3586 = vmatprep.subr.bf16.mxu1 %v4932_v28  ;;  %3709 = vmatprep.subr.bf16.mxu0 %v4935_v30  ;;  %v5370_v30 = vsub.s32 6, %v5128_v29  ;;  %v952_v35 = vrot.slane %v5300_v16, %v5373_v31 }
 0x20a   :  { %v3808_v47 = vcombine.low %v5322_v33, %v5326_v37  ;;  %v3825_v48 = vcombine.low %v5324_v34, %v5328_v38  ;;  %v972_v33 = vrot.slane %v5340_v57, %v5295_v14  ;;  %v992_v34 = vrot.slane %v5393_v55, %v5303_v17 }
 0x20b   :  { %v948_v32 = vrot.slane %v5300_v16, %v5370_v30 }
 0x20c   :  { %3587 = vmatpush1.bf16.msra.mxu1 %v4930_v41  ;;  %3710 = vmatpush1.bf16.msra.mxu0 %v4933_v42  ;;  %v3816_v25 = vrot.slane %v3808_v47, %v5361_v9  ;;  %v3833_v16 = vrot.slane %v3825_v48, %v5361_v9 }
 0x20d   :  { %3588 = vmatprep.subr.bf16.mxu1 %v4938_v45  ;;  %3711 = vmatprep.subr.bf16.mxu0 %v4941_v46 }
 0x210   :  { %3589 = vmatpush1.bf16.msra.mxu1 %v4936_v49  ;;  %3712 = vmatpush1.bf16.msra.mxu0 %v4939_v50 }
 0x211   :  { %3664 = vmatprep.subr.bf16.mxu1 %v4944_v51 }
 0x213   :  { %4444 = vmatmul.mubr.msk.bf16.vlgmr.msra.gmra.mrb[64].mxu1 %vm2471_vm2, %v5211_v52  ;;  %4447 = vmatmul.mubr.msk.bf16.vlgmr.msra.gmra.mrb[64].mxu0 %vm2471_vm2, %v5211_v52 }
 0x214   :  { %3665 = vmatpush1.bf16.msra.mxu1 %v4942_v56  ;;  %3696 = vmatprep.mubr.bf16.mxu1 %v5008_v23  ;;  %v964_v56 = vrot.slane %v5340_v57, %v5335_v53 }
 0x215   :  { %3666 = vmatprep.subr.bf16.mxu1 %v4947_v59  ;;  %v988_v59 = vrot.slane %v5393_v55, %v5292_v13 }
 0x216   :  { %v2550_v3 = vpop.f32.mrb[12].mxu1  ;;  %v2673_v4 = vpop.f32.mrb[12].mxu0 }
 0x217   :  { %v2551_v5 = vadd.f32 %v2550_v3, %v932_v60  ;;  %v5358_v6 = vadd.f32 %v2673_v4, %v956_v61  ;;  %v2552_v7 = vpop.f32.mrb[13].mxu1  ;;  %v2675_v8 = vpop.f32.mrb[13].mxu0  ;;  %v968_v60 = vrot.slane %v5340_v57, %v5343_v58 }
 0x218   :  { %v2553_v10 = vadd.f32 %v2552_v7, %v936_v63  ;;  %v5363_v11 = vadd.f32 %v2675_v8, %v960_v0  ;;  %v2554_v12 = vpop.f32.mrb[14].mxu1  ;;  %v2677_v15 = vpop.f32.mrb[14].mxu0  ;;  %3667 = vmatpush1.bf16.msra.mxu1 %v4945_v1 }
 0x219   :  { %v2555_v23 = vpop.f32.mrb[15].mxu1  ;;  %v2678_v20 = vpop.f32.mrb[15].mxu0  ;;  %3668 = vmatprep.subr.bf16.mxu1 %v4950_v2  ;;  %v980_v15 = vrot.slane %v5340_v57, %v5370_v30 }
 0x21a   :  { %v3809_v22 = vcombine.low %v2551_v5, %v2553_v10  ;;  %v3842_v24 = vcombine.low %v5358_v6, %v5363_v11  ;;  %v984_v23 = vrot.slane %v5340_v57, %v5373_v31  ;;  %v1008_v20 = vrot.slane %v5393_v55, %v5306_v18 }
 0x21c   :  { %v3823_v26 = vrot.slane %v3809_v22, %v5361_v9  ;;  %3669 = vmatpush1.bf16.msra.mxu1 %v4948_v19  ;;  %v3850_v10 = vrot.slane %v3842_v24, %v5361_v9  ;;  %v1004_v19 = vrot.slane %v5393_v55, %v5295_v14 }
 0x21d   :  { %3670 = vmatprep.subr.bf16.mxu1 %v4953_v21 }
 0x21e   :  { %v3824_v28 = vcombine.low %v3816_v25, %v3823_v26 }
 0x220   :  { %4087 = vst [vmem:[#allocation5] sm:$0xff] %v3824_v28  ;;  %3671 = vmatpush1.bf16.msra.mxu1 %v4951_v27 }
 0x223   :  { %4446 = vmatmul.mubr.msk.bf16.vlgmr.msra.gmra.mrb[68].mxu1 %vm2471_vm2, %v5211_v52 }
 0x226   :  { %v2632_v37 = vpop.f32.mrb[16].mxu1  ;;  %v2755_v39 = vpop.f32.mrb[16].mxu0 }
 0x227   :  { %v2633_v40 = vadd.f32 %v2632_v37, %v948_v32  ;;  %v2756_v29 = vadd.f32 %v2755_v39, %v972_v33  ;;  %v2634_v41 = vpop.f32.mrb[17].mxu1  ;;  %v2757_v42 = vpop.f32.mrb[17].mxu0 }
 0x228   :  { %v2635_v43 = vadd.f32 %v2634_v41, %v952_v35  ;;  %v2758_v52 = vadd.f32 %v2757_v42, %v976_v36  ;;  %v2636_v44 = vpop.f32.mrb[18].mxu1  ;;  %v2759_v45 = vpop.f32.mrb[18].mxu0  ;;  %v5418_v42 = vld [vmem:[%s5554_s4 + $0x18] sm:$0xff] }
 0x229   :  { %v2637_v46 = vpop.f32.mrb[19].mxu1  ;;  %v2760_v47 = vpop.f32.mrb[19].mxu0  ;;  %v1000_v44 = vrot.slane %v5393_v55, %v5343_v58  ;;  %v1024_v45 = vrot.slane %v5418_v42, %v5303_v17 }
 0x22a   :  { %v3826_v49 = vcombine.low %v2633_v40, %v2635_v43  ;;  %v3859_v50 = vcombine.low %v2756_v29, %v2758_v52  ;;  %v996_v43 = vrot.slane %v5393_v55, %v5335_v53  ;;  %v1020_v52 = vrot.slane %v5418_v42, %v5292_v13 }
 0x22c   :  { %v3840_v51 = vrot.slane %v3826_v49, %v5361_v9  ;;  %v3867_v29 = vrot.slane %v3859_v50, %v5361_v9 }
 0x22e   :  { %v3841_v54 = vcombine.low %v3833_v16, %v3840_v51 }
 0x230   :  { %4088 = vst [vmem:[#allocation5 + $0x8] sm:$0xff] %v3841_v54 }
 0x236   :  { %v2714_v38 = vpop.f32.mrb[20].mxu1  ;;  %v2837_v48 = vpop.f32.mrb[20].mxu0 }
 0x237   :  { %v2715_v61 = vadd.f32 %v2714_v38, %v964_v56  ;;  %v2838_v62 = vadd.f32 %v2837_v48, %v988_v59  ;;  %v2716_v63 = vpop.f32.mrb[21].mxu1  ;;  %v2839_v0 = vpop.f32.mrb[21].mxu0 }
 0x238   :  { %v2717_v1 = vadd.f32 %v2716_v63, %v968_v60  ;;  %v2840_v2 = vadd.f32 %v2839_v0, %v992_v34  ;;  %v2718_v3 = vpop.f32.mrb[22].mxu1  ;;  %v2841_v4 = vpop.f32.mrb[22].mxu0 }
 0x239   :  { %v2719_v5 = vpop.f32.mrb[23].mxu1  ;;  %v2842_v6 = vpop.f32.mrb[23].mxu0  ;;  %v1016_v3 = vrot.slane %v5393_v55, %v5373_v31  ;;  %v1040_v4 = vrot.slane %v5418_v42, %v5306_v18 }
 0x23a   :  { %v3843_v7 = vcombine.low %v2715_v61, %v2717_v1  ;;  %v3876_v8 = vcombine.low %v2838_v62, %v2840_v2  ;;  %v1012_v1 = vrot.slane %v5393_v55, %v5370_v30  ;;  %v1036_v2 = vrot.slane %v5418_v42, %v5295_v14 }
 0x23c   :  { %v3857_v11 = vrot.slane %v3843_v7, %v5361_v9  ;;  %v3884_v62 = vrot.slane %v3876_v8, %v5361_v9 }
 0x23e   :  { %v3858_v12 = vcombine.low %v3850_v10, %v3857_v11 }
 0x240   :  { %4089 = vst [vmem:[#allocation5 + $0x10] sm:$0xff] %v3858_v12 }
 0x246   :  { %v2796_v21 = vpop.f32.mrb[24].mxu1  ;;  %v2919_v22 = vpop.f32.mrb[24].mxu0 }
 0x247   :  { %v2797_v25 = vadd.f32 %v2796_v21, %v980_v15  ;;  %v2920_v24 = vadd.f32 %v2919_v22, %v1004_v19  ;;  %v2798_v26 = vpop.f32.mrb[25].mxu1  ;;  %v2921_v27 = vpop.f32.mrb[25].mxu0 }
 0x248   :  { %v2799_v28 = vadd.f32 %v2798_v26, %v984_v23  ;;  %v2922_v32 = vadd.f32 %v2921_v27, %v1008_v20  ;;  %v2800_v33 = vpop.f32.mrb[26].mxu1  ;;  %v2923_v35 = vpop.f32.mrb[26].mxu0  ;;  %v5443_v27 = vld [vmem:[%s5554_s4 + $0x20] sm:$0xff] }
 0x249   :  { %v2801_v36 = vpop.f32.mrb[27].mxu1  ;;  %v2924_v37 = vpop.f32.mrb[27].mxu0  ;;  %v1032_v33 = vrot.slane %v5418_v42, %v5343_v58  ;;  %v1056_v35 = vrot.slane %v5443_v27, %v5303_v17 }
 0x24a   :  { %v3860_v39 = vcombine.low %v2797_v25, %v2799_v28  ;;  %v3893_v40 = vcombine.low %v2920_v24, %v2922_v32  ;;  %v1028_v28 = vrot.slane %v5418_v42, %v5335_v53  ;;  %v1052_v32 = vrot.slane %v5443_v27, %v5292_v13 }
 0x24c   :  { %v3874_v57 = vrot.slane %v3860_v39, %v5361_v9  ;;  %v3901_v24 = vrot.slane %v3893_v40, %v5361_v9 }
 0x24e   :  { %v3875_v41 = vcombine.low %v3867_v29, %v3874_v57 }
 0x250   :  { %4090 = vst [vmem:[#allocation5 + $0x18] sm:$0xff] %v3875_v41 }
 0x256   :  { %v2878_v46 = vpop.f32.mrb[28].mxu1  ;;  %v3001_v47 = vpop.f32.mrb[28].mxu0 }
 0x257   :  { %v2879_v49 = vadd.f32 %v2878_v46, %v996_v43  ;;  %v3002_v50 = vadd.f32 %v3001_v47, %v1020_v52  ;;  %v2880_v16 = vpop.f32.mrb[29].mxu1  ;;  %v3003_v51 = vpop.f32.mrb[29].mxu0 }
 0x258   :  { %v2881_v54 = vadd.f32 %v2880_v16, %v1000_v44  ;;  %v3004_v56 = vadd.f32 %v3003_v51, %v1024_v45  ;;  %v2882_v59 = vpop.f32.mrb[30].mxu1  ;;  %v3005_v60 = vpop.f32.mrb[30].mxu0 }
 0x259   :  { %v2883_v34 = vpop.f32.mrb[31].mxu1  ;;  %v3006_v38 = vpop.f32.mrb[31].mxu0  ;;  %v1048_v59 = vrot.slane %v5418_v42, %v5373_v31  ;;  %v1072_v60 = vrot.slane %v5443_v27, %v5306_v18 }
 0x25a   :  { %v3877_v48 = vcombine.low %v2879_v49, %v2881_v54  ;;  %v3910_v61 = vcombine.low %v3002_v50, %v3004_v56  ;;  %v1044_v54 = vrot.slane %v5418_v42, %v5370_v30  ;;  %v1068_v56 = vrot.slane %v5443_v27, %v5295_v14 }
 0x25c   :  { %v3891_v63 = vrot.slane %v3877_v48, %v5361_v9  ;;  %v3918_v50 = vrot.slane %v3910_v61, %v5361_v9 }
 0x25e   :  { %v3892_v0 = vcombine.low %v3884_v62, %v3891_v63 }
 0x260   :  { %4091 = vst [vmem:[#allocation5 + $0x20] sm:$0xff] %v3892_v0 }
 0x266   :  { %v2960_v5 = vpop.f32.mrb[32].mxu1  ;;  %v3083_v6 = vpop.f32.mrb[32].mxu0 }
 0x267   :  { %v2961_v7 = vadd.f32 %v2960_v5, %v1012_v1  ;;  %v3084_v8 = vadd.f32 %v3083_v6, %v1036_v2  ;;  %v2962_v10 = vpop.f32.mrb[33].mxu1  ;;  %v3085_v11 = vpop.f32.mrb[33].mxu0 }
 0x268   :  { %v2963_v12 = vadd.f32 %v2962_v10, %v1016_v3  ;;  %v3086_v15 = vadd.f32 %v3085_v11, %v1040_v4  ;;  %v2964_v19 = vpop.f32.mrb[34].mxu1  ;;  %v3087_v23 = vpop.f32.mrb[34].mxu0  ;;  %v5468_v11 = vld [vmem:[%s5554_s4 + $0x28] sm:$0xff] }
 0x269   :  { %v2965_v20 = vpop.f32.mrb[35].mxu1  ;;  %v3088_v21 = vpop.f32.mrb[35].mxu0  ;;  %v1064_v19 = vrot.slane %v5443_v27, %v5343_v58  ;;  %v1088_v23 = vrot.slane %v5468_v11, %v5303_v17 }
 0x26a   :  { %v3894_v22 = vcombine.low %v2961_v7, %v2963_v12  ;;  %v3927_v25 = vcombine.low %v3084_v8, %v3086_v15  ;;  %v1060_v12 = vrot.slane %v5443_v27, %v5335_v53  ;;  %v1084_v15 = vrot.slane %v5468_v11, %v5292_v13 }
 0x26c   :  { %v3908_v55 = vrot.slane %v3894_v22, %v5361_v9  ;;  %v3935_v8 = vrot.slane %v3927_v25, %v5361_v9 }
 0x26e   :  { %v3909_v26 = vcombine.low %v3901_v24, %v3908_v55 }
 0x270   :  { %4092 = vst [vmem:[#allocation5 + $0x28] sm:$0xff] %v3909_v26 }
 0x276   :  { %v3042_v36 = vpop.f32.mrb[36].mxu1  ;;  %v3165_v37 = vpop.f32.mrb[36].mxu0 }
 0x277   :  { %v3043_v39 = vadd.f32 %v3042_v36, %v1028_v28  ;;  %v3166_v40 = vadd.f32 %v3165_v37, %v1052_v32  ;;  %v3044_v29 = vpop.f32.mrb[37].mxu1  ;;  %v3167_v57 = vpop.f32.mrb[37].mxu0 }
 0x278   :  { %v3045_v41 = vadd.f32 %v3044_v29, %v1032_v33  ;;  %v3168_v43 = vadd.f32 %v3167_v57, %v1056_v35  ;;  %v3046_v52 = vpop.f32.mrb[38].mxu1  ;;  %v3169_v44 = vpop.f32.mrb[38].mxu0 }
 0x279   :  { %v3047_v45 = vpop.f32.mrb[39].mxu1  ;;  %v3170_v46 = vpop.f32.mrb[39].mxu0  ;;  %v1080_v52 = vrot.slane %v5443_v27, %v5373_v31  ;;  %v1104_v44 = vrot.slane %v5468_v11, %v5306_v18 }
 0x27a   :  { %v3911_v47 = vcombine.low %v3043_v39, %v3045_v41  ;;  %v3944_v49 = vcombine.low %v3166_v40, %v3168_v43  ;;  %v1076_v41 = vrot.slane %v5443_v27, %v5370_v30  ;;  %v1100_v43 = vrot.slane %v5468_v11, %v5295_v14 }
 0x27c   :  { %v3925_v16 = vrot.slane %v3911_v47, %v5361_v9  ;;  %v3952_v40 = vrot.slane %v3944_v49, %v5361_v9 }
 0x27e   :  { %v3926_v51 = vcombine.low %v3918_v50, %v3925_v16 }
 0x280   :  { %4093 = vst [vmem:[#allocation5 + $0x30] sm:$0xff] %v3926_v51 }
 0x286   :  { %v3124_v34 = vpop.f32.mrb[40].mxu1  ;;  %v3247_v38 = vpop.f32.mrb[40].mxu0 }
 0x287   :  { %v3125_v48 = vadd.f32 %v3124_v34, %v1044_v54  ;;  %v3248_v61 = vadd.f32 %v3247_v38, %v1068_v56  ;;  %v3126_v62 = vpop.f32.mrb[41].mxu1  ;;  %v3249_v63 = vpop.f32.mrb[41].mxu0 }
 0x288   :  { %v3127_v0 = vadd.f32 %v3126_v62, %v1048_v59  ;;  %v3250_v1 = vadd.f32 %v3249_v63, %v1072_v60  ;;  %v3128_v2 = vpop.f32.mrb[42].mxu1  ;;  %v3251_v3 = vpop.f32.mrb[42].mxu0  ;;  %v5493_v63 = vld [vmem:[%s5554_s4 + $0x30] sm:$0xff] }
 0x289   :  { %v3129_v4 = vpop.f32.mrb[43].mxu1  ;;  %v3252_v5 = vpop.f32.mrb[43].mxu0  ;;  %v1096_v2 = vrot.slane %v5468_v11, %v5343_v58  ;;  %v1120_v3 = vrot.slane %v5493_v63, %v5303_v17 }
 0x28a   :  { %v3928_v6 = vcombine.low %v3125_v48, %v3127_v0  ;;  %v3961_v7 = vcombine.low %v3248_v61, %v3250_v1  ;;  %v1092_v0 = vrot.slane %v5468_v11, %v5335_v53  ;;  %v1116_v1 = vrot.slane %v5493_v63, %v5292_v13 }
 0x28c   :  { %v3942_v42 = vrot.slane %v3928_v6, %v5361_v9  ;;  %v3969_v61 = vrot.slane %v3961_v7, %v5361_v9 }
 0x28e   :  { %v3943_v10 = vcombine.low %v3935_v8, %v3942_v42 }
 0x290   :  { %4094 = vst [vmem:[#allocation5 + $0x38] sm:$0xff] %v3943_v10 }
 0x296   :  { %v3206_v20 = vpop.f32.mrb[44].mxu1  ;;  %v3329_v21 = vpop.f32.mrb[44].mxu0 }
 0x297   :  { %v3207_v22 = vadd.f32 %v3206_v20, %v1060_v12  ;;  %v3330_v25 = vadd.f32 %v3329_v21, %v1084_v15  ;;  %v3208_v24 = vpop.f32.mrb[45].mxu1  ;;  %v3331_v55 = vpop.f32.mrb[45].mxu0 }
 0x298   :  { %v3209_v26 = vadd.f32 %v3208_v24, %v1064_v19  ;;  %v3332_v28 = vadd.f32 %v3331_v55, %v1088_v23  ;;  %v3210_v32 = vpop.f32.mrb[46].mxu1  ;;  %v3333_v33 = vpop.f32.mrb[46].mxu0 }
 0x299   :  { %v3211_v35 = vpop.f32.mrb[47].mxu1  ;;  %v3334_v36 = vpop.f32.mrb[47].mxu0  ;;  %v1112_v32 = vrot.slane %v5468_v11, %v5373_v31  ;;  %v1136_v33 = vrot.slane %v5493_v63, %v5306_v18 }
 0x29a   :  { %v3945_v37 = vcombine.low %v3207_v22, %v3209_v26  ;;  %v3978_v39 = vcombine.low %v3330_v25, %v3332_v28  ;;  %v1108_v26 = vrot.slane %v5468_v11, %v5370_v30  ;;  %v1132_v28 = vrot.slane %v5493_v63, %v5295_v14 }
 0x29c   :  { %v3959_v29 = vrot.slane %v3945_v37, %v5361_v9  ;;  %v3986_v25 = vrot.slane %v3978_v39, %v5361_v9 }
 0x29e   :  { %v3960_v57 = vcombine.low %v3952_v40, %v3959_v29 }
 0x2a0   :  { %4095 = vst [vmem:[#allocation5 + $0x40] sm:$0xff] %v3960_v57 }
 0x2a6   :  { %v3288_v45 = vpop.f32.mrb[48].mxu1  ;;  %v3411_v46 = vpop.f32.mrb[48].mxu0 }
 0x2a7   :  { %v3289_v47 = vadd.f32 %v3288_v45, %v1076_v41  ;;  %v3412_v49 = vadd.f32 %v3411_v46, %v1100_v43  ;;  %v3290_v50 = vpop.f32.mrb[49].mxu1  ;;  %v3413_v16 = vpop.f32.mrb[49].mxu0 }
 0x2a8   :  { %v3291_v51 = vadd.f32 %v3290_v50, %v1080_v52  ;;  %v3414_v54 = vadd.f32 %v3413_v16, %v1104_v44  ;;  %v3292_v56 = vpop.f32.mrb[50].mxu1  ;;  %v3415_v59 = vpop.f32.mrb[50].mxu0  ;;  %v912_v16 = vld [vmem:[%s5554_s4 + $0x38] sm:$0x3f]  ;;  %s5010_s4 = smov [#allocation5]  }
 0x2a9   :  { %v3293_v60 = vpop.f32.mrb[51].mxu1  ;;  %v3416_v34 = vpop.f32.mrb[51].mxu0  ;;  %v1128_v56 = vrot.slane %v5493_v63, %v5343_v58  ;;  %v1152_v59 = vrot.slane %v912_v16, %v5303_v17  ;;  %v1140_v17 = vrot.slane %v5493_v63, %v5370_v30  ;;  %s4109_s16 = sshll.u32 %s5010_s4, 4  ;;  %s4110_s16 = int_to_ptr.vmem [resolvable:$true] %s4109_s16 }
 0x2aa   :  { %v3962_v38 = vcombine.low %v3289_v47, %v3291_v51  ;;  %v3995_v48 = vcombine.low %v3412_v49, %v3414_v54  ;;  %v1124_v51 = vrot.slane %v5493_v63, %v5335_v53  ;;  %v1148_v54 = vrot.slane %v912_v16, %v5292_v13  ;;  %s4976_s17 = scalar_lea.vmem %s4110_s16, 1984  ;;  %p4981_p9 = scmp.lt.s32.totalorder %s4110_s16, %s4110_s16 }
 0x2ab   :  { %p4977_p8 = scmp.ne.s32.totalorder %s4110_s16, %s4976_s17  ;;  %p4982_p10 = scmp.lt.s32.totalorder %s4976_s17, %s4976_s17 }
 0x2ac   :  { %v3976_v27 = vrot.slane %v3962_v38, %v5361_v9  ;;  %v4003_v49 = vrot.slane %v3995_v48, %v5361_v9 }
 0x2ad   :  { %p4983_p11 = por %p4982_p10, %p4981_p9 }
 0x2ae   :  { %v3977_v62 = vcombine.low %v3969_v61, %v3976_v27 }
 0x2af   :  { %p4984_p12 = pnand %p4983_p11, %p4977_p8 }
 0x2b0   :  { %4096 = vst [vmem:[#allocation5 + $0x48] sm:$0xff] %v3977_v62 }
 0x2b6   :  { %v3370_v4 = vpop.f32.mrb[52].mxu1  ;;  %v3493_v5 = vpop.f32.mrb[52].mxu0 }
 0x2b7   :  { %v3371_v6 = vadd.f32 %v3370_v4, %v1092_v0  ;;  %v3494_v7 = vadd.f32 %v3493_v5, %v1116_v1  ;;  %v3372_v8 = vpop.f32.mrb[53].mxu1  ;;  %v3495_v42 = vpop.f32.mrb[53].mxu0 }
 0x2b8   :  { %v3373_v10 = vadd.f32 %v3372_v8, %v1096_v2  ;;  %v3496_v12 = vadd.f32 %v3495_v42, %v1120_v3  ;;  %v3374_v15 = vpop.f32.mrb[54].mxu1  ;;  %v3497_v19 = vpop.f32.mrb[54].mxu0  ;;  %v1164_v42 = vrot.slane %v912_v16, %v5295_v14 }
 0x2b9   :  { %v3375_v23 = vpop.f32.mrb[55].mxu1  ;;  %v3498_v20 = vpop.f32.mrb[55].mxu0 }
 0x2ba   :  { %v3979_v21 = vcombine.low %v3371_v6, %v3373_v10  ;;  %v4012_v22 = vcombine.low %v3494_v7, %v3496_v12  ;;  %v1144_v10 = vrot.slane %v5493_v63, %v5373_v31  ;;  %v1168_v12 = vrot.slane %v912_v16, %v5306_v18 }
 0x2bb   :  { %v1156_v63 = vrot.slane %v912_v16, %v5335_v53 }
 0x2bc   :  { %v3993_v24 = vrot.slane %v3979_v21, %v5361_v9  ;;  %v4020_v13 = vrot.slane %v4012_v22, %v5361_v9 }
 0x2be   :  { %v3994_v55 = vcombine.low %v3986_v25, %v3993_v24 }
 0x2c0   :  { %4097 = vst [vmem:[#allocation5 + $0x50] sm:$0xff] %v3994_v55 }
 0x2c6   :  { %v3452_v35 = vpop.f32.mrb[56].mxu1  ;;  %v3575_v36 = vpop.f32.mrb[56].mxu0 }
 0x2c7   :  { %v3453_v37 = vadd.f32 %v3452_v35, %v1108_v26  ;;  %v3576_v39 = vadd.f32 %v3575_v36, %v1132_v28  ;;  %v3454_v40 = vpop.f32.mrb[57].mxu1  ;;  %v3577_v29 = vpop.f32.mrb[57].mxu0  ;;  %v1160_v35 = vrot.slane %v912_v16, %v5343_v58 }
 0x2c8   :  { %v3455_v57 = vadd.f32 %v3454_v40, %v1112_v32  ;;  %v3578_v41 = vadd.f32 %v3577_v29, %v1136_v33  ;;  %v3456_v43 = vpop.f32.mrb[58].mxu1  ;;  %v3579_v52 = vpop.f32.mrb[58].mxu0 }
 0x2c9   :  { %v3457_v44 = vpop.f32.mrb[59].mxu1  ;;  %v3580_v45 = vpop.f32.mrb[59].mxu0 }
 0x2ca   :  { %v3996_v46 = vcombine.low %v3453_v37, %v3455_v57  ;;  %v4029_v47 = vcombine.low %v3576_v39, %v3578_v41 }
 0x2cc   :  { %v4010_v11 = vrot.slane %v3996_v46, %v5361_v9  ;;  %v4037_v14 = vrot.slane %v4029_v47, %v5361_v9 }
 0x2ce   :  { %v4011_v50 = vcombine.low %v4003_v49, %v4010_v11 }
 0x2d0   :  { %4098 = vst [vmem:[#allocation5 + $0x58] sm:$0xff] %v4011_v50 }
 0x2d6   :  { %v3534_v60 = vpop.f32.mrb[60].mxu1  ;;  %v3657_v34 = vpop.f32.mrb[60].mxu0 }
 0x2d7   :  { %v3535_v38 = vadd.f32 %v3534_v60, %v1124_v51  ;;  %v3658_v48 = vadd.f32 %v3657_v34, %v1148_v54  ;;  %v3536_v61 = vpop.f32.mrb[61].mxu1  ;;  %v3659_v27 = vpop.f32.mrb[61].mxu0 }
 0x2d8   :  { %v3537_v62 = vadd.f32 %v3536_v61, %v1128_v56  ;;  %v3660_v0 = vadd.f32 %v3659_v27, %v1152_v59  ;;  %v3538_v1 = vpop.f32.mrb[62].mxu1  ;;  %v3661_v2 = vpop.f32.mrb[62].mxu0 }
 0x2d9   :  { %v3539_v3 = vpop.f32.mrb[63].mxu1  ;;  %v3662_v4 = vpop.f32.mrb[63].mxu0 }
 0x2da   :  { %v4013_v5 = vcombine.low %v3535_v38, %v3537_v62  ;;  %v4046_v6 = vcombine.low %v3658_v48, %v3660_v0 }
 0x2dc   :  { %v4027_v7 = vrot.slane %v4013_v5, %v5361_v9  ;;  %v4054_v43 = vrot.slane %v4046_v6, %v5361_v9 }
 0x2de   :  { %v4028_v8 = vcombine.low %v4020_v13, %v4027_v7 }
 0x2e0   :  { %4099 = vst [vmem:[#allocation5 + $0x60] sm:$0xff] %v4028_v8 }
 0x2e6   :  { %v3616_v15 = vpop.f32.mrb[64].mxu1  ;;  %v3739_v19 = vpop.f32.mrb[64].mxu0 }
 0x2e7   :  { %v3617_v23 = vadd.f32 %v3616_v15, %v1140_v17  ;;  %v3740_v20 = vadd.f32 %v3739_v19, %v1164_v42  ;;  %v3618_v21 = vpop.f32.mrb[65].mxu1  ;;  %v3741_v22 = vpop.f32.mrb[65].mxu0 }
 0x2e8   :  { %v3619_v25 = vadd.f32 %v3618_v21, %v1144_v10  ;;  %v3742_v24 = vadd.f32 %v3741_v22, %v1168_v12  ;;  %v3620_v55 = vpop.f32.mrb[66].mxu1  ;;  %v3743_v26 = vpop.f32.mrb[66].mxu0 }
 0x2e9   :  { %v3621_v28 = vpop.f32.mrb[67].mxu1  ;;  %v3744_v32 = vpop.f32.mrb[67].mxu0 }
 0x2ea   :  { %v4030_v30 = vcombine.low %v3617_v23, %v3619_v25  ;;  %v4063_v33 = vcombine.low %v3740_v20, %v3742_v24 }
 0x2ec   :  { %v4044_v31 = vrot.slane %v4030_v30, %v5361_v9  ;;  %4448 = vst.sshfl [vmem:[#allocation5 + $0x78] sm:$0x33 pattern:$0x76325410] %v4063_v33 }
 0x2ee   :  { %v4045_v18 = vcombine.low %v4037_v14, %v4044_v31 }
 0x2f0   :  { %4100 = vst [vmem:[#allocation5 + $0x68] sm:$0xff] %v4045_v18 }
 0x2f6   :  { %v3698_v36 = vpop.f32.mrb[68].mxu1 }
 0x2f7   :  { %v3699_v37 = vadd.f32 %v3698_v36, %v1156_v63  ;;  %v3700_v39 = vpop.f32.mrb[69].mxu1 }
 0x2f8   :  { %v3701_v40 = vadd.f32 %v3700_v39, %v1160_v35  ;;  %v3702_v29 = vpop.f32.mrb[70].mxu1 }
 0x2f9   :  { %v3703_v57 = vpop.f32.mrb[71].mxu1 }
 0x2fa   :  { %v4047_v41 = vcombine.low %v3699_v37, %v3701_v40 }
 0x2fc   :  { %v4061_v52 = vrot.slane %v4047_v41, %v5361_v9 }
 0x2fe   :  { %v4062_v44 = vcombine.low %v4054_v43, %v4061_v52 }
 0x300   :  { %4101 = vst [vmem:[#allocation5 + $0x70] sm:$0xff] %v4062_v44 }
 0x301   :  { %4987 = shalt.err (!%p4984_p12)
}
 0x302   :  { %s4988_s20 = scalar_lea.hbm %s5555_s5, 1984 }
 0x303   :  { %p4989_p13 = scmp.ne.s32.totalorder %s5555_s5, %s4988_s20  ;;  %p4992_p0 = scmp.lt.u32.totalorder %s4988_s20, %s5555_s5 }
 0x305   :  { %p4994_p1 = pnand %p4992_p0, %p4989_p13 }
 0x307   :  { %4997 = shalt.err (!%p4994_p1)
}
 0x308   :  { %4112 = dma.vmem_to_hbm [thread:$0]  %s4110_s16, 1984, %s5555_s5, [#allocation4]  }
 0x309   :  { %5000 = dma.done.wait [#allocation4], 1984  }
 0x30a   :  { %5001 = vsyncadd [#allocation4], 4294965312 }
 0x30b   :  { %4116 = vsyncpa [#allocation3], 1 }
 0x30c   :  { %4117 = vsyncpa [#allocation4], 1 }

</bundles_post_ra>
